<compile_context>
chip_gen: v7x
topology: tpu7x:2x2x1
jax: 0.10.0
libtpu: 0.0.40
codegen_flags: <defaults>
</compile_context>

<pallas_src>
import math

import jax
import jax.numpy as jnp
from jax.experimental import pallas as pl
from jax.experimental.pallas import tpu as pltpu

_HP = jax.lax.Precision.HIGHEST


def _conditioning_kernel(x_ref, m1_ref, b1_ref, m2_ref, b2_ref, o_ref):
    # x_ref: (B, G*in) -- G logical rows interleaved per sublane row.
    x = x_ref[...]
    # Layer 1 (+interleave handling folded into m1): (B, G*in) @ (G*in, G*hid)
    h = jnp.dot(x, m1_ref[...], preferred_element_type=jnp.float32, precision=_HP)
    h = jnp.tanh(h + b1_ref[...])                        # EUP tanh, bias bcast over sublanes
    # Layer 2: (B, G*hid) @ (G*hid, G*out)
    y = jnp.dot(h, m2_ref[...], preferred_element_type=jnp.float32, precision=_HP)
    o_ref[...] = (y + b2_ref[...]).astype(o_ref.dtype)   # lane-dense store


def conditioning_network(conds, w1, b1, w2, b2, *,
                         rows_per_tile=128 * 1024,
                         vmem_limit_bytes=48 * 1024 * 1024):
    """conds: (batch, seq, input_size) -> (batch, seq, condition_size)."""
    if conds is None:
        return None

    batch, seq, in_dim = conds.shape
    hid = w1.shape[1]
    cond_dim = w2.shape[1]
    n = batch * seq

    cdiv = lambda a, b: -(-a // b)
    round_up = lambda a, b: cdiv(a, b) * b

    # Rows packed per sublane-row so that the input view's lane dim is a
    # multiple of 128 (dense VMEM layout, no 32x narrow-lane blowup).
    g = 128 // math.gcd(in_dim, 128)          # in_dim=4 -> g=32

    # Zero-copy views (pad rows only if n is not a multiple of g).
    n_pad = round_up(n, g)
    x_flat = conds.reshape(n, in_dim)
    if n_pad != n:
        x_flat = jnp.pad(x_flat, ((0, n_pad - n), (0, 0)))
    R = n_pad // g
    x_view = x_flat.reshape(R, g * in_dim)    # contiguous -> zero-copy

    # Interleave-absorbing block-diagonal weights and lane-tiled biases.
    m1 = jnp.kron(jnp.eye(g, dtype=w1.dtype), w1)        # (g*in,  g*hid)
    m2 = jnp.kron(jnp.eye(g, dtype=w2.dtype), w2)        # (g*hid, g*out)
    b1r = jnp.tile(b1, g).reshape(1, g * hid)
    b2r = jnp.tile(b2, g).reshape(1, g * cond_dim)

    # --- Tile selection --------------------------------------------------
    # max_b: VMEM-driven cap on sublane rows per block (multiple of 8).
    max_b = max(8, (rows_per_tile // g) // 8 * 8)
    # Prefer >=2 grid steps when there is enough work so the "parallel" grid
    # axis can shard across both v7x TCs and in/out DMAs stay pipelined.
    want_steps = 2 if R >= 16 else 1
    steps = max(cdiv(R, max_b), want_steps)
    if steps == 1:
        block_rows = R                         # full extent (always legal)
    else:
        block_rows = min(max_b, round_up(cdiv(R, steps), 8))
    grid = (cdiv(R, block_rows),)

    # Advisory cost estimate (actual MXU flops of the block-diagonal form).
    flops = 2 * R * (g * in_dim * g * hid + g * hid * g * cond_dim)
    bytes_accessed = 4 * (R * g * (in_dim + cond_dim)
                          + m1.size + m2.size + b1r.size + b2r.size)
    cost = pl.CostEstimate(flops=int(flops),
                           transcendentals=int(R * g * hid),
                           bytes_accessed=int(bytes_accessed))

    out_view = pl.pallas_call(
        _conditioning_kernel,
        out_shape=jax.ShapeDtypeStruct((R, g * cond_dim), conds.dtype),
        grid_spec=pltpu.PrefetchScalarGridSpec(
            num_scalar_prefetch=0,
            grid=grid,
            in_specs=[
                pl.BlockSpec((block_rows, g * in_dim), lambda i: (i, 0)),   # x rows
                pl.BlockSpec((g * in_dim, g * hid), lambda i: (0, 0)),      # kron(I,W1)
                pl.BlockSpec((1, g * hid), lambda i: (0, 0)),               # b1 tiled
                pl.BlockSpec((g * hid, g * cond_dim), lambda i: (0, 0)),    # kron(I,W2)
                pl.BlockSpec((1, g * cond_dim), lambda i: (0, 0)),          # b2 tiled
            ],
            out_specs=pl.BlockSpec((block_rows, g * cond_dim), lambda i: (i, 0)),
        ),
        compiler_params=pltpu.CompilerParams(
            dimension_semantics=("parallel",),
            vmem_limit_bytes=vmem_limit_bytes),
        cost_estimate=cost,
    )(x_view, m1, b1r, m2, b2r)

    out = out_view.reshape(n_pad, cond_dim)    # zero-copy
    if n_pad != n:
        out = out[:n]
    return out.reshape(batch, seq, cond_dim)


def init_params(key, input_size, condition_size, hidden=8):
    """Deterministic synthetic parameters (PyTorch-Linear-like uniform init)."""
    k1, k2, k3, k4 = jax.random.split(key, 4)
    lim1 = 1.0 / jnp.sqrt(input_size)
    lim2 = 1.0 / jnp.sqrt(hidden)
    w1 = jax.random.uniform(k1, (input_size, hidden), jnp.float32, -lim1, lim1)
    b1 = jax.random.uniform(k2, (hidden,), jnp.float32, -lim1, lim1)
    w2 = jax.random.uniform(k3, (hidden, condition_size), jnp.float32, -lim2, lim2)
    b2 = jax.random.uniform(k4, (condition_size,), jnp.float32, -lim2, lim2)
    return w1, b1, w2, b2


def _reference(conds, w1, b1, w2, b2):
    h = jnp.tanh(jnp.einsum("bsi,ih->bsh", conds, w1, precision=_HP) + b1)
    return jnp.einsum("bsh,hc->bsc", h, w2, precision=_HP) + b2


if __name__ == "__main__":
    input_size, condition_size = 4, 6
    key = jax.random.PRNGKey(0)
    k_x1, k_x2, k_p = jax.random.split(key, 3)
    w1, b1, w2, b2 = init_params(k_p, input_size, condition_size)

    # Case 1: the module's canonical small shape (n = 16, padded to one group).
    batch, seq = 2, 8
    conds = jax.random.normal(k_x1, (batch, seq, input_size), jnp.float32)
    out = jax.block_until_ready(conditioning_network(conds, w1, b1, w2, b2))
    assert out.shape == (batch, seq, condition_size)
    assert jnp.allclose(out, _reference(conds, w1, b1, w2, b2), atol=1e-5, rtol=1e-5)

    # Case 2: ragged row count + multi-step grid (exercises padding & masking).
    batch2, seq2 = 3, 300                      # n = 900 -> padded to 928 rows
    conds2 = jax.random.normal(k_x2, (batch2, seq2, input_size), jnp.float32)
    out2 = jax.block_until_ready(
        conditioning_network(conds2, w1, b1, w2, b2, rows_per_tile=512))
    assert out2.shape == (batch2, seq2, condition_size)
    assert jnp.allclose(out2, _reference(conds2, w1, b1, w2, b2), atol=1e-5, rtol=1e-5)

    print("KERNEL_OK")
</pallas_src>

<mosaic_0001>
module attributes {stable_mosaic.version = 11 : i64} {
  func.func @_conditioning_kernel(%arg0: i32, %arg1: memref<1x128xf32, #tpu.memory_space<vmem>>, %arg2: memref<128x256xf32, #tpu.memory_space<vmem>>, %arg3: memref<1x256xf32, #tpu.memory_space<vmem>>, %arg4: memref<256x192xf32, #tpu.memory_space<vmem>>, %arg5: memref<1x192xf32, #tpu.memory_space<vmem>>, %arg6: memref<1x192xf32, #tpu.memory_space<vmem>>) attributes {dimension_semantics = [#tpu.dimension_semantics<parallel>], iteration_bounds = array<i64: 1>, scalar_prefetch = 0 : i64, scratch_operands = 0 : i64, tpu.core_type = #tpu.core_type<tc>, window_params = [{transform_indices = @transform_0, window_bounds = array<i64: 1, 128>}, {pipeline_mode = #tpu.pipeline_mode<synchronous>, transform_indices = @transform_1, window_bounds = array<i64: 128, 256>}, {pipeline_mode = #tpu.pipeline_mode<synchronous>, transform_indices = @transform_2, window_bounds = array<i64: 1, 256>}, {pipeline_mode = #tpu.pipeline_mode<synchronous>, transform_indices = @transform_3, window_bounds = array<i64: 256, 192>}, {pipeline_mode = #tpu.pipeline_mode<synchronous>, transform_indices = @transform_4, window_bounds = array<i64: 1, 192>}, {transform_indices = @transform_5, window_bounds = array<i64: 1, 192>}]} {
    %c0 = arith.constant 0 : index
    %c0_0 = arith.constant 0 : index
    %0 = vector.load %arg1[%c0, %c0_0] : memref<1x128xf32, #tpu.memory_space<vmem>>, vector<1x128xf32>
    %c0_1 = arith.constant 0 : index
    %c0_2 = arith.constant 0 : index
    %1 = vector.load %arg2[%c0_1, %c0_2] : memref<128x256xf32, #tpu.memory_space<vmem>>, vector<128x256xf32>
    %cst = arith.constant dense<0.000000e+00> : vector<1x256xf32>
    %2 = tpu.matmul %0, %1, %cst {dimension_numbers = #tpu.dot_dimension_numbers<[1], [0], [0], [1], [0, 0, 1, 1], [], []>, precision = #tpu.contract_precision<fp32>} : vector<1x128xf32>, vector<128x256xf32>, vector<1x256xf32> -> vector<1x256xf32>
    %c0_3 = arith.constant 0 : index
    %c0_4 = arith.constant 0 : index
    %3 = vector.load %arg3[%c0_3, %c0_4] : memref<1x256xf32, #tpu.memory_space<vmem>>, vector<1x256xf32>
    %4 = arith.addf %2, %3 : vector<1x256xf32>
    %5 = math.tanh %4 : vector<1x256xf32>
    %c0_5 = arith.constant 0 : index
    %c0_6 = arith.constant 0 : index
    %6 = vector.load %arg4[%c0_5, %c0_6] : memref<256x192xf32, #tpu.memory_space<vmem>>, vector<256x192xf32>
    %cst_7 = arith.constant dense<0.000000e+00> : vector<1x192xf32>
    %7 = tpu.matmul %5, %6, %cst_7 {dimension_numbers = #tpu.dot_dimension_numbers<[1], [0], [0], [1], [0, 0, 1, 1], [], []>, precision = #tpu.contract_precision<fp32>} : vector<1x256xf32>, vector<256x192xf32>, vector<1x192xf32> -> vector<1x192xf32>
    %c0_8 = arith.constant 0 : index
    %c0_9 = arith.constant 0 : index
    %8 = vector.load %arg5[%c0_8, %c0_9] : memref<1x192xf32, #tpu.memory_space<vmem>>, vector<1x192xf32>
    %9 = arith.addf %7, %8 : vector<1x192xf32>
    %c0_10 = arith.constant 0 : index
    %c0_11 = arith.constant 0 : index
    %10 = vector.load %arg6[%c0_10, %c0_11] : memref<1x192xf32, #tpu.memory_space<vmem>>, vector<1x192xf32>
    tpu.vector_store %arg6[%c0_10, %c0_11], %9 {strides = array<i32>} : memref<1x192xf32, #tpu.memory_space<vmem>>, vector<1x192xf32>,
    return
  }
  func.func @transform_0(%arg0: i32) -> (i32, i32) {
    %c0_i32 = arith.constant 0 : i32
    %c0_i32_0 = arith.constant 0 : i32
    return %arg0, %c0_i32 : i32, i32
  }
  func.func @transform_1(%arg0: i32) -> (i32, i32) {
    %c0_i32 = arith.constant 0 : i32
    %c0_i32_0 = arith.constant 0 : i32
    %c0_i32_1 = arith.constant 0 : i32
    return %c0_i32, %c0_i32_0 : i32, i32
  }
  func.func @transform_2(%arg0: i32) -> (i32, i32) {
    %c0_i32 = arith.constant 0 : i32
    %c0_i32_0 = arith.constant 0 : i32
    %c0_i32_1 = arith.constant 0 : i32
    return %c0_i32, %c0_i32_0 : i32, i32
  }
  func.func @transform_3(%arg0: i32) -> (i32, i32) {
    %c0_i32 = arith.constant 0 : i32
    %c0_i32_0 = arith.constant 0 : i32
    %c0_i32_1 = arith.constant 0 : i32
    return %c0_i32, %c0_i32_0 : i32, i32
  }
  func.func @transform_4(%arg0: i32) -> (i32, i32) {
    %c0_i32 = arith.constant 0 : i32
    %c0_i32_0 = arith.constant 0 : i32
    %c0_i32_1 = arith.constant 0 : i32
    return %c0_i32, %c0_i32_0 : i32, i32
  }
  func.func @transform_5(%arg0: i32) -> (i32, i32) {
    %c0_i32 = arith.constant 0 : i32
    %c0_i32_0 = arith.constant 0 : i32
    return %arg0, %c0_i32 : i32, i32
  }
}

</mosaic_0001>

<bundles_post_ra>
// kernel: tpu_custom_call.1
= control target key start
LH: loop header
LB: loop body
LE: loop exit
PB: predicated region body
PF: predicated region fallthrough
CT: control target
= control target key end

     0   :  { %v5013_v9 = vmov 0.0   ;;  %s5005_s0 = inlined_call_operand.vmem [shape: f32[1,128], index: 0, kind: input, shape index: {}]   ;;  %s5006_s1 = inlined_call_operand.vmem [shape: f32[128,256], index: 1, kind: input, shape index: {}]   ;;  %s5007_s2 = inlined_call_operand.vmem [shape: f32[1,256], index: 2, kind: input, shape index: {}]   ;;  %s5008_s3 = inlined_call_operand.vmem [shape: f32[256,192], index: 3, kind: input, shape index: {}]   ;;  %s5009_s4 = inlined_call_operand.vmem [shape: f32[1,192], index: 4, kind: input, shape index: {}]   ;;  %s5010_s5 = inlined_call_operand.hbm [shape: f32[1,192], index: 5, kind: output, shape index: {}]  }
   0x1   :  { %v23_v0 = vld [vmem:[%s5006_s1 + $0x8] sm:$0xff]  ;;  %v25_v1 = vld [vmem:[%s5006_s1 + $0x18] sm:$0xff]  ;;  %v22_v2 = vld [vmem:[%s5006_s1] sm:$0xff]  ;;  %162 = vmatprep.mubr.f32.mxu0 %v5013_v9 }
   0x2   :  { %v66_v3 = vand.u32 4294901760, %v23_v0  ;;  %v70_v4 = vand.u32 4294901760, %v25_v1  ;;  %v24_v5 = vld [vmem:[%s5006_s1 + $0x10] sm:$0xff]  ;;  %v68_v6 = vand.u32 4294901760, %v22_v2  ;;  %v27_v7 = vld [vmem:[%s5006_s1 + $0x28] sm:$0xff]  ;;  %v29_v8 = vld [vmem:[%s5006_s1 + $0x38] sm:$0xff] }
   0x3   :  { %v72_v10 = vand.u32 4294901760, %v24_v5  ;;  %v74_v11 = vand.u32 4294901760, %v27_v7  ;;  %v78_v12 = vand.u32 4294901760, %v29_v8  ;;  %v26_v13 = vld [vmem:[%s5006_s1 + $0x20] sm:$0xff]  ;;  %v28_v14 = vld [vmem:[%s5006_s1 + $0x30] sm:$0xff]  ;;  %v31_v15 = vld [vmem:[%s5006_s1 + $0x48] sm:$0xff] }
   0x4   :  { %v3012_v16 = vpack.c.bf16 %v70_v4, %v66_v3  ;;  %v33_v17 = vld [vmem:[%s5006_s1 + $0x58] sm:$0xff]  ;;  %v30_v18 = vld [vmem:[%s5006_s1 + $0x40] sm:$0xff]  ;;  %v32_v19 = vld [vmem:[%s5006_s1 + $0x50] sm:$0xff]  ;;  %v76_v23 = vand.u32 4294901760, %v26_v13  ;;  %v80_v24 = vand.u32 4294901760, %v28_v14  ;;  %v82_v25 = vand.u32 4294901760, %v31_v15 }
   0x5   :  { %v3023_v20 = vpack.c.bf16 %v72_v10, %v68_v6  ;;  %v3025_v21 = vpack.c.bf16 %v78_v12, %v74_v11  ;;  %v35_v22 = vld [vmem:[%s5006_s1 + $0x68] sm:$0xff]  ;;  %v86_v26 = vand.u32 4294901760, %v33_v17  ;;  %v84_v27 = vand.u32 4294901760, %v30_v18  ;;  %v37_v29 = vld [vmem:[%s5006_s1 + $0x78] sm:$0xff]  ;;  %v34_v30 = vld [vmem:[%s5006_s1 + $0x60] sm:$0xff] }
   0x6   :  { %5301 = vst [vmem:[#allocation5_spill] sm:$0xff] %v3012_v16  ;;  %2321 = vmatprep.subr.bf16.mxu0 %v3012_v16  ;;  %v88_v28 = vand.u32 4294901760, %v32_v19  ;;  %v3039_v31 = vpack.c.bf16 %v80_v24, %v76_v23  ;;  %v90_v32 = vand.u32 4294901760, %v35_v22  ;;  %v36_v33 = vld [vmem:[%s5006_s1 + $0x70] sm:$0xff]  ;;  %v39_v34 = vld [vmem:[%s5006_s1 + $0x88] sm:$0xff]  ;;  %v41_v35 = vld [vmem:[%s5006_s1 + $0x98] sm:$0xff]  ;;  %v3050_v36 = vsub.f32 %v23_v0, %v66_v3 }
   0x7   :  { %5302 = vst [vmem:[#allocation6_spill] sm:$0xff] %v3023_v20  ;;  %5303 = vst [vmem:[#allocation7_spill] sm:$0xff] %v3025_v21  ;;  %2323 = vmatpush1.bf16.msra.mxu0 %v3023_v20  ;;  %v3052_v37 = vsub.f32 %v25_v1, %v70_v4  ;;  %v3054_v38 = vsub.f32 %v22_v2, %v68_v6  ;;  %v3056_v39 = vpack.c.bf16 %v86_v26, %v82_v25  ;;  %v38_v44 = vld [vmem:[%s5006_s1 + $0x80] sm:$0xff]  ;;  %v40_v49 = vld [vmem:[%s5006_s1 + $0x90] sm:$0xff] }
   0x8   :  { %2325 = vmatprep.subr.bf16.mxu0 %v3025_v21  ;;  %5304 = vst [vmem:[#allocation8_spill] sm:$0xff] %v3039_v31  ;;  %v3058_v40 = vsub.f32 %v24_v5, %v72_v10  ;;  %v3060_v41 = vsub.f32 %v27_v7, %v74_v11  ;;  %v3062_v42 = vpack.c.bf16 %v88_v28, %v84_v27  ;;  %v94_v43 = vand.u32 4294901760, %v37_v29  ;;  %v43_v50 = vld [vmem:[%s5006_s1 + $0xa8] sm:$0xff]  ;;  %v45_v55 = vld [vmem:[%s5006_s1 + $0xb8] sm:$0xff]  ;;  %v42_v56 = vld [vmem:[%s5006_s1 + $0xa0] sm:$0xff] }
   0x9   :  { %5305 = vst [vmem:[#allocation9_spill] sm:$0xff] %v3056_v39  ;;  %v92_v45 = vand.u32 4294901760, %v34_v30  ;;  %v96_v46 = vand.u32 4294901760, %v36_v33  ;;  %v98_v47 = vand.u32 4294901760, %v39_v34  ;;  %v102_v48 = vand.u32 4294901760, %v41_v35 }
   0xa   :  { %5306 = vst [vmem:[#allocation10_spill] sm:$0xff] %v3062_v42  ;;  %v3074_v51 = vsub.f32 %v29_v8, %v78_v12  ;;  %v3076_v52 = vsub.f32 %v26_v13, %v76_v23  ;;  %v3078_v53 = vsub.f32 %v28_v14, %v80_v24  ;;  %v3081_v54 = vpack.c.bf16 %v94_v43, %v90_v32 }
   0xb   :  { %2327 = vmatpush1.bf16.msra.mxu0 %v3039_v31 }
   0xc   :  { %2329 = vmatprep.subr.bf16.mxu0 %v3056_v39  ;;  %5307 = vst [vmem:[#allocation11_spill] sm:$0xff] %v3081_v54 }
   0xd   :  { %10 = vsyncpa [#allocation3], 0  ;;  %v3089_v57 = vsub.f32 %v31_v15, %v82_v25  ;;  %v3091_v58 = vsub.f32 %v33_v17, %v86_v26  ;;  %v3093_v59 = vsub.f32 %v30_v18, %v84_v27  ;;  %v3095_v60 = vsub.f32 %v32_v19, %v88_v28  ;;  %v44_v61 = vld [vmem:[%s5006_s1 + $0xb0] sm:$0xff]  ;;  %v47_v62 = vld [vmem:[%s5006_s1 + $0xc8] sm:$0xff]  ;;  %s2953_s28 = smov [#allocation2]  }
   0xe   :  { %v49_v63 = vld [vmem:[%s5006_s1 + $0xd8] sm:$0xff]  ;;  %v3106_v0 = vsub.f32 %v35_v22, %v90_v32  ;;  %v3108_v1 = vsub.f32 %v37_v29, %v94_v43  ;;  %v100_v2 = vand.u32 4294901760, %v38_v44  ;;  %v104_v3 = vand.u32 4294901760, %v40_v49  ;;  %v46_v8 = vld [vmem:[%s5006_s1 + $0xc0] sm:$0xff]  ;;  %v48_v10 = vld [vmem:[%s5006_s1 + $0xd0] sm:$0xff] }
   0xf   :  { %2331 = vmatpush1.bf16.msra.mxu0 %v3062_v42  ;;  %v3111_v4 = vpack.c.bf16 %v96_v46, %v92_v45  ;;  %v3113_v5 = vpack.c.bf16 %v102_v48, %v98_v47  ;;  %v106_v6 = vand.u32 4294901760, %v43_v50  ;;  %v110_v7 = vand.u32 4294901760, %v45_v55  ;;  %v21_v26 = vld [vmem:[%s5005_s0] sm:$0x1]  ;;  %v51_v43 = vld [vmem:[%s5006_s1 + $0xe8] sm:$0xff] }
  0x10   :  { %2333 = vmatprep.subr.bf16.mxu0 %v3081_v54  ;;  %v108_v11 = vand.u32 4294901760, %v42_v56  ;;  %v112_v12 = vand.u32 4294901760, %v44_v61  ;;  %v114_v13 = vand.u32 4294901760, %v47_v62  ;;  %v118_v14 = vand.u32 4294901760, %v49_v63 }
  0x11   :  { %5308 = vst [vmem:[#allocation12_spill] sm:$0xff] %v3111_v4  ;;  %5309 = vst [vmem:[#allocation13_spill] sm:$0xff] %v3113_v5  ;;  %v3122_v15 = vsub.f32 %v34_v30, %v92_v45  ;;  %v3124_v17 = vsub.f32 %v36_v33, %v96_v46  ;;  %v3126_v18 = vsub.f32 %v39_v34, %v98_v47  ;;  %v116_v24 = vand.u32 4294901760, %v46_v8  ;;  %v53_v45 = vld [vmem:[%s5006_s1 + $0xf8] sm:$0xff] }
  0x12   :  { %v3128_v19 = vsub.f32 %v41_v35, %v102_v48  ;;  %v3130_v22 = vpack.c.bf16 %v104_v3, %v100_v2  ;;  %v3132_v23 = vsub.f32 %v38_v44, %v100_v2  ;;  %v120_v25 = vand.u32 4294901760, %v48_v10 }
  0x13   :  { %2335 = vmatpush1.bf16.msra.mxu0 %v3111_v4  ;;  %v3138_v27 = vsub.f32 %v40_v49, %v104_v3  ;;  %v3140_v28 = vpack.c.bf16 %v110_v7, %v106_v6  ;;  %v3142_v29 = vsub.f32 %v43_v50, %v106_v6  ;;  %v3144_v30 = vsub.f32 %v45_v55, %v110_v7 }
  0x14   :  { %5310 = vst [vmem:[#allocation14_spill] sm:$0xff] %v3130_v22  ;;  %2337 = vmatprep.subr.bf16.mxu0 %v3113_v5  ;;  %v3147_v32 = vpack.c.bf16 %v112_v12, %v108_v11  ;;  %v3149_v33 = vsub.f32 %v42_v56, %v108_v11  ;;  %v3151_v34 = vsub.f32 %v44_v61, %v112_v12  ;;  %v5011_v46 = vand.u32 4294901760, %v3050_v36  ;;  %v50_v56 = vld [vmem:[%s5006_s1 + $0xe0] sm:$0xff]  ;;  %v3179_v61 = vld [vmem:[%s5006_s1 + $0xf0] sm:$0xff] }
  0x15   :  { %5311 = vst [vmem:[#allocation15_spill] sm:$0xff] %v3140_v28  ;;  %v3153_v35 = vpack.c.bf16 %v118_v14, %v114_v13  ;;  %v3158_v44 = vsub.f32 %v47_v62, %v114_v13  ;;  %v5012_v47 = vand.u32 4294901760, %v3052_v37  ;;  %v3165_v48 = vand.u32 4294901760, %v21_v26 }
  0x16   :  { %5312 = vst [vmem:[#allocation16_spill] sm:$0xff] %v3147_v32  ;;  %v3167_v49 = vsub.f32 %v49_v63, %v118_v14  ;;  %v3169_v50 = vpack.c.bf16 %v120_v25, %v116_v24  ;;  %v3171_v55 = vsub.f32 %v46_v8, %v116_v24  ;;  %v5015_v62 = vand.u32 4294901760, %v3054_v38 }
  0x17   :  { %5313 = vst [vmem:[#allocation17_spill] sm:$0xff] %v3153_v35  ;;  %5314 = vst [vmem:[#allocation18_spill] sm:$0xff] %v3165_v48  ;;  %2339 = vmatpush1.bf16.msra.mxu0 %v3130_v22  ;;  %v3183_v2 = vsub.f32 %v48_v10, %v120_v25  ;;  %v122_v63 = vand.u32 4294901760, %v51_v43  ;;  %v177_v3 = vsub.f32 %v3050_v36, %v5011_v46  ;;  %v126_v7 = vand.u32 4294901760, %v53_v45 }
  0x18   :  { %5315 = vst [vmem:[#allocation19_spill] sm:$0xff] %v3167_v49  ;;  %5316 = vst [vmem:[#allocation20_spill] sm:$0xff] %v3169_v50  ;;  %v189_v6 = vsub.f32 %v3052_v37, %v5012_v47  ;;  %2341 = vmatprep.subr.bf16.mxu0 %v3140_v28  ;;  %v3193_v8 = vsub.f32 %v21_v26, %v3165_v48  ;;  %v5016_v11 = vand.u32 4294901760, %v3058_v40  ;;  %v5021_v10 = vand.u32 4294901760, %v3060_v41 }
  0x19   :  { %5317 = vst [vmem:[#allocation21_spill] sm:$0xff] %v3171_v55  ;;  %5318 = vst [vmem:[#allocation22_spill] sm:$0xff] %v3183_v2  ;;  %v124_v12 = vand.u32 4294901760, %v50_v56  ;;  %v5022_v14 = vand.u32 4294901760, %v3074_v51  ;;  %v178_v25 = vand.u32 4294901760, %v177_v3  ;;  %v183_v26 = vsub.f32 %v3054_v38, %v5015_v62 }
  0x1a   :  { %5319 = vst [vmem:[#allocation23_spill] sm:$0xff] %v3193_v8  ;;  %v190_v46 = vand.u32 4294901760, %v189_v6  ;;  %v195_v9 = vsub.f32 %v3058_v40, %v5016_v11  ;;  %v201_v13 = vsub.f32 %v3060_v41, %v5021_v10  ;;  %v5031_v6 = vand.u32 4294901760, %v3078_v53 }
  0x1b   :  { %2343 = vmatpush1.bf16.msra.mxu0 %v3147_v32  ;;  %v213_v3 = vsub.f32 %v3074_v51, %v5022_v14  ;;  %v3216_v47 = vpack.c.bf16 %v126_v7, %v122_v63  ;;  %v3218_v62 = vsub.f32 %v51_v43, %v122_v63  ;;  %v3220_v24 = vsub.f32 %v53_v45, %v126_v7 }
  0x1c   :  { %2345 = vmatprep.subr.bf16.mxu0 %v3153_v35  ;;  %v5321_v32 = vand.u32 4294901760, %v3179_v61  ;;  %v5323_v10 = vand.u32 4294901760, %v3076_v52  ;;  %v219_v35 = vsub.f32 %v3078_v53, %v5031_v6  ;;  %v5036_v22 = vand.u32 4294901760, %v3091_v58 }
  0x1d   :  { %5320 = vst [vmem:[#allocation24_spill] sm:$0xff] %v3216_v47  ;;  %v2352_v43 = vpack.c.bf16 %v190_v46, %v178_v25  ;;  %v5324_v45 = vand.u32 4294901760, %v3193_v8  ;;  %v184_v7 = vand.u32 4294901760, %v183_v26  ;;  %v202_v5 = vand.u32 4294901760, %v201_v13 }
  0x1e   :  { %v3225_v28 = vpack.c.bf16 %v5321_v32, %v124_v12  ;;  %v207_v14 = vsub.f32 %v3076_v52, %v5323_v10  ;;  %v196_v32 = vand.u32 4294901760, %v195_v9  ;;  %v214_v4 = vand.u32 4294901760, %v213_v3 }
  0x1f   :  { %v166_v63 = vsub.f32 %v3193_v8, %v5324_v45  ;;  %2347 = vmatpush1.bf16.msra.mxu0 %v3169_v50  ;;  %v5039_v10 = vand.u32 4294901760, %v3095_v60  ;;  %v5325_v6 = vand.u32 4294901760, %v3089_v57  ;;  %v237_v25 = vsub.f32 %v3091_v58, %v5036_v22 }
  0x20   :  { %5322 = vst [vmem:[#allocation25_spill] sm:$0xff] %v3225_v28  ;;  %2349 = vmatprep.subr.bf16.mxu0 %v3216_v47  ;;  %v5044_v26 = vand.u32 4294901760, %v3106_v0  ;;  %v5049_v45 = vand.u32 4294901760, %v3108_v1  ;;  %v208_v11 = vand.u32 4294901760, %v207_v14  ;;  %v220_v9 = vand.u32 4294901760, %v219_v35 }
  0x21   :  { %v225_v46 = vsub.f32 %v3089_v57, %v5325_v6  ;;  %v5326_v13 = vand.u32 4294901760, %v3093_v59  ;;  %v243_v47 = vsub.f32 %v3095_v60, %v5039_v10  ;;  %v167_v50 = vand.u32 4294901760, %v166_v63 }
  0x22   :  { %v249_v6 = vsub.f32 %v3106_v0, %v5044_v26  ;;  %v261_v22 = vsub.f32 %v3108_v1, %v5049_v45  ;;  %v3263_v35 = vsub.f32 %v50_v56, %v124_v12  ;;  %v5060_v54 = vand.u32 4294901760, %v3124_v17 }
  0x23   :  { %v231_v3 = vsub.f32 %v3093_v59, %v5326_v13  ;;  %2351 = vmatpush1.bf16.msra.mxu0 %v3225_v28  ;;  %v2354_v13 = vpack.c.bf16 %v196_v32, %v184_v7  ;;  %v5054_v10 = vand.u32 4294901760, %v3126_v18  ;;  %v2356_v63 = vpack.c.bf16 %v214_v4, %v202_v5 }
  0x24   :  { %2353 = vmatprep.subr.bf16.mxu0 %v2352_v43  ;;  %v226_v42 = vand.u32 4294901760, %v225_v46  ;;  %v238_v39 = vand.u32 4294901760, %v237_v25  ;;  %v5053_v26 = vand.u32 4294901760, %v3128_v19  ;;  %v2358_v31 = vpack.c.bf16 %v220_v9, %v208_v11 }
  0x25   :  { %v232_v21 = vand.u32 4294901760, %v231_v3  ;;  %v244_v45 = vand.u32 4294901760, %v243_v47  ;;  %v5052_v14 = vand.u32 4294901760, %v3132_v23  ;;  %v250_v28 = vand.u32 4294901760, %v249_v6 }
  0x26   :  { %168 = vmatmul.mubr.f32.vlgmr.msra.gmra.mrb[0].mxu0 %v167_v50  ;;  %v262_v56 = vand.u32 4294901760, %v261_v22  ;;  %v5327_v12 = vand.u32 4294901760, %v3122_v15  ;;  %v5055_v32 = vand.u32 4294901760, %v3138_v27  ;;  %v267_v4 = vsub.f32 %v3124_v17, %v5060_v54 }
  0x27   :  { %2355 = vmatpush1.bf16.msra.mxu0 %v2354_v13  ;;  %v273_v5 = vsub.f32 %v3126_v18, %v5054_v10  ;;  %v285_v47 = vsub.f32 %v3128_v19, %v5053_v26  ;;  %v5328_v22 = vmov 0.0   ;;  %v2360_v50 = vpack.c.bf16 %v238_v39, %v226_v42 }
  0x28   :  { %v255_v7 = vsub.f32 %v3122_v15, %v5327_v12  ;;  %398 = vmatprep.mubr.f32.mxu0 %v5328_v22  ;;  %2357 = vmatprep.subr.bf16.mxu0 %v2356_v63  ;;  %v279_v11 = vsub.f32 %v3132_v23, %v5052_v14  ;;  %v5059_v43 = vand.u32 4294901760, %v3142_v29  ;;  %v5058_v46 = vand.u32 4294901760, %v3144_v30 }
  0x29   :  { %v5329_v25 = vand.u32 4294901760, %v3179_v61  ;;  %v291_v3 = vsub.f32 %v3138_v27, %v5055_v32  ;;  %v5056_v6 = vand.u32 4294901760, %v3149_v33  ;;  %v5057_v39 = vand.u32 4294901760, %v3151_v34 }
  0x2a   :  { %v2362_v42 = vpack.c.bf16 %v244_v45, %v232_v21  ;;  %v2364_v13 = vpack.c.bf16 %v262_v56, %v250_v28  ;;  %v256_v63 = vand.u32 4294901760, %v255_v7  ;;  %v5063_v12 = vand.u32 4294901760, %v3158_v44 }
  0x2b   :  { %v3291_v9 = vsub.f32 %v3179_v61, %v5329_v25  ;;  %2359 = vmatpush1.bf16.msra.mxu0 %v2358_v31  ;;  %v268_v14 = vand.u32 4294901760, %v267_v4  ;;  %v274_v26 = vand.u32 4294901760, %v273_v5  ;;  %v286_v10 = vand.u32 4294901760, %v285_v47 }
  0x2c   :  { %v332_v61 = vand.u32 4294901760, %v3167_v49  ;;  %2361 = vmatprep.subr.bf16.mxu0 %v2360_v50  ;;  %v280_v25 = vand.u32 4294901760, %v279_v11  ;;  %v297_v32 = vsub.f32 %v3142_v29, %v5059_v43  ;;  %v309_v21 = vsub.f32 %v3144_v30, %v5058_v46 }
  0x2d   :  { %v326_v28 = vand.u32 4294901760, %v3171_v55  ;;  %v292_v45 = vand.u32 4294901760, %v291_v3  ;;  %v303_v31 = vsub.f32 %v3149_v33, %v5056_v6  ;;  %v315_v56 = vsub.f32 %v3151_v34, %v5057_v39 }
  0x2e   :  { %v338_v7 = vand.u32 4294901760, %v3183_v2  ;;  %v321_v4 = vsub.f32 %v3158_v44, %v5063_v12  ;;  %v333_v5 = vsub.f32 %v3167_v49, %v332_v61  ;;  %v344_v47 = vand.u32 4294901760, %v3218_v62 }
  0x2f   :  { %v356_v50 = vand.u32 4294901760, %v3220_v24  ;;  %2363 = vmatpush1.bf16.msra.mxu0 %v2362_v42  ;;  %v2366_v11 = vpack.c.bf16 %v268_v14, %v256_v63  ;;  %v327_v3 = vsub.f32 %v3171_v55, %v326_v28  ;;  %v350_v39 = vand.u32 4294901760, %v3263_v35 }
  0x30   :  { %v339_v6 = vsub.f32 %v3183_v2, %v338_v7  ;;  %2365 = vmatprep.subr.bf16.mxu0 %v2364_v13  ;;  %v2368_v46 = vpack.c.bf16 %v286_v10, %v274_v26  ;;  %v298_v43 = vand.u32 4294901760, %v297_v32  ;;  %v310_v54 = vand.u32 4294901760, %v309_v21 }
  0x31   :  { %v2370_v20 = vpack.c.bf16 %v292_v45, %v280_v25  ;;  %v304_v12 = vand.u32 4294901760, %v303_v31  ;;  %v316_v8 = vand.u32 4294901760, %v315_v56  ;;  %v322_v16 = vand.u32 4294901760, %v321_v4 }
  0x32   :  { %v334_v22 = vand.u32 4294901760, %v333_v5  ;;  %v345_v49 = vsub.f32 %v3218_v62, %v344_v47  ;;  %v357_v42 = vsub.f32 %v3220_v24, %v356_v50  ;;  %v328_v14 = vand.u32 4294901760, %v327_v3 }
  0x33   :  { %2367 = vmatpush1.bf16.msra.mxu0 %v2366_v11  ;;  %v340_v63 = vand.u32 4294901760, %v339_v6  ;;  %v351_v2 = vsub.f32 %v3263_v35, %v350_v39  ;;  %v362_v55 = vand.u32 4294901760, %v3291_v9  ;;  %v2372_v10 = vpack.c.bf16 %v310_v54, %v298_v43 }
  0x34   :  { %2369 = vmatprep.subr.bf16.mxu0 %v2368_v46  ;;  %v2374_v26 = vpack.c.bf16 %v316_v8, %v304_v12  ;;  %v2376_v32 = vpack.c.bf16 %v334_v22, %v322_v16  ;;  %v346_v13 = vand.u32 4294901760, %v345_v49  ;;  %v358_v25 = vand.u32 4294901760, %v357_v42 }
  0x35   :  { %v2378_v21 = vpack.c.bf16 %v340_v63, %v328_v14  ;;  %v352_v45 = vand.u32 4294901760, %v351_v2  ;;  %v363_v31 = vsub.f32 %v3291_v9, %v362_v55  ;;  %v5330_v56 = vand.u32 4294901760, %v3050_v36 }
  0x36   :  { %v5331_v4 = vand.u32 4294901760, %v3052_v37  ;;  %v5332_v5 = vand.u32 4294901760, %v3054_v38  ;;  %v5333_v54 = vand.u32 4294901760, %v3058_v40  ;;  %v5334_v16 = vand.u32 4294901760, %v3060_v41 }
  0x37   :  { %2371 = vmatpush1.bf16.msra.mxu0 %v2370_v20  ;;  %v5335_v20 = vand.u32 4294901760, %v3074_v51  ;;  %v5336_v2 = vand.u32 4294901760, %v3076_v52  ;;  %v5337_v22 = vand.u32 4294901760, %v3078_v53  ;;  %v5338_v46 = vand.u32 4294901760, %v3089_v57 }
  0x38   :  { %v3332_v6 = vpack.c.bf16 %v5331_v4, %v5330_v56  ;;  %2373 = vmatprep.subr.bf16.mxu0 %v2372_v10  ;;  %v3338_v8 = vpack.c.bf16 %v5333_v54, %v5332_v5  ;;  %v5339_v12 = vand.u32 4294901760, %v3091_v58  ;;  %v5340_v3 = vand.u32 4294901760, %v3093_v59 }
  0x39   :  { %v3344_v49 = vpack.c.bf16 %v5335_v20, %v5334_v16  ;;  %v3350_v43 = vpack.c.bf16 %v5337_v22, %v5336_v2  ;;  %v5341_v42 = vand.u32 4294901760, %v3095_v60  ;;  %v5342_v63 = vand.u32 4294901760, %v3106_v0 }
  0x3a   :  { %v3356_v11 = vpack.c.bf16 %v5339_v12, %v5338_v46  ;;  %v5343_v10 = vand.u32 4294901760, %v3108_v1  ;;  %v5344_v4 = vand.u32 4294901760, %v3122_v15  ;;  %v5345_v5 = vand.u32 4294901760, %v3124_v17 }
  0x3b   :  { %v3362_v14 = vpack.c.bf16 %v5341_v42, %v5340_v3  ;;  %v5346_v16 = vand.u32 4294901760, %v3126_v18  ;;  %v5347_v20 = vand.u32 4294901760, %v3128_v19  ;;  %v5349_v22 = vand.u32 4294901760, %v3132_v23  ;;  %2375 = vmatpush1.bf16.msra.mxu0 %v2374_v26 }
  0x3c   :  { %v3368_v56 = vpack.c.bf16 %v5343_v10, %v5342_v63  ;;  %v3374_v54 = vpack.c.bf16 %v5345_v5, %v5344_v4  ;;  %v5350_v46 = vand.u32 4294901760, %v3138_v27  ;;  %v5352_v3 = vand.u32 4294901760, %v3142_v29  ;;  %2377 = vmatprep.subr.bf16.mxu0 %v2376_v32 }
  0x3d   :  { %v3380_v2 = vpack.c.bf16 %v5347_v20, %v5346_v16  ;;  %v5353_v42 = vand.u32 4294901760, %v3144_v30  ;;  %v5354_v10 = vand.u32 4294901760, %v3149_v33  ;;  %v5355_v4 = vand.u32 4294901760, %v3151_v34 }
  0x3e   :  { %v3386_v12 = vpack.c.bf16 %v5350_v46, %v5349_v22  ;;  %v5356_v16 = vand.u32 4294901760, %v3158_v44  ;;  %v3404_v22 = vpack.c.bf16 %v338_v7, %v326_v28  ;;  %v3406_v46 = vpack.c.bf16 %v356_v50, %v344_v47 }
  0x3f   :  { %5348 = vst [vmem:[#allocation26_spill] sm:$0xff] %v3380_v2  ;;  %v3392_v63 = vpack.c.bf16 %v5353_v42, %v5352_v3  ;;  %v3398_v5 = vpack.c.bf16 %v5355_v4, %v5354_v10  ;;  %v364_v2 = vand.u32 4294901760, %v363_v31  ;;  %v2380_v3 = vpack.c.bf16 %v358_v25, %v346_v13  ;;  %2379 = vmatpush1.bf16.msra.mxu0 %v2378_v21  ;;  %v3462_v13 = vld [vmem:[%s5008_s3 + $0x10] sm:$0xff]  ;;  %v3468_v21 = vld [vmem:[%s5008_s3 + $0x28] sm:$0xff] }
  0x40   :  { %5351 = vst [vmem:[#allocation27_spill] sm:$0xff] %v3386_v12  ;;  %v3402_v20 = vpack.c.bf16 %v332_v61, %v5356_v16  ;;  %v3408_v12 = vpack.c.bf16 %v362_v55, %v350_v39  ;;  %v2384_v10 = vpack.c.bf16 %v3052_v37, %v3050_v36  ;;  %v2386_v61 = vpack.c.bf16 %v3058_v40, %v3054_v38  ;;  %v3562_v38 = vld [vmem:[%s5008_s3 + $0x58] sm:$0xff] }
  0x41   :  { %v2382_v42 = vpack.c.bf16 %v364_v2, %v352_v45  ;;  %2381 = vmatprep.subr.bf16.mxu0 %v2380_v3  ;;  %v2388_v28 = vpack.c.bf16 %v3074_v51, %v3060_v41  ;;  %v2390_v55 = vpack.c.bf16 %v3078_v53, %v3076_v52  ;;  %v2392_v39 = vpack.c.bf16 %v3091_v58, %v3089_v57  ;;  %v5357_v52 = vld [vmem:[#allocation19_spill] sm:$0xff]  ;;  %v5358_v57 = vld [vmem:[#allocation21_spill] sm:$0xff]  ;;  %v5359_v58 = vld [vmem:[#allocation22_spill] sm:$0xff] }
  0x42   :  { %v2394_v7 = vpack.c.bf16 %v3095_v60, %v3093_v59  ;;  %v2396_v36 = vpack.c.bf16 %v3108_v1, %v3106_v0  ;;  %v3442_v60 = vld [vmem:[%s5008_s3 + $0x8] sm:$0xff]  ;;  %v3447_v0 = vld [vmem:[%s5008_s3 + $0x18] sm:$0xff]  ;;  %v3452_v1 = vld [vmem:[%s5008_s3] sm:$0xff]  ;;  %v5360_v50 = vmov 0.0   ;;  %v5076_v2 = vand.u32 4294901760, %v3462_v13 }
  0x43   :  { %2383 = vmatpush1.bf16.msra.mxu0 %v2382_v42  ;;  %v999_v26 = vand.u32 4294901760, %v3442_v60  ;;  %v1003_v32 = vand.u32 4294901760, %v3447_v0  ;;  %v5077_v25 = vand.u32 4294901760, %v3452_v1  ;;  %v3473_v45 = vld [vmem:[%s5008_s3 + $0x38] sm:$0xff]  ;;  %v5074_v4 = vand.u32 4294901760, %v3468_v21  ;;  %v3483_v3 = vld [vmem:[%s5008_s3 + $0x20] sm:$0xff] }
  0x44   :  { %2385 = vmatprep.subr.bf16.mxu0 %v2384_v10  ;;  %v5075_v16 = vand.u32 4294901760, %v3473_v45  ;;  %v3488_v42 = vld [vmem:[%s5008_s3 + $0x30] sm:$0xff]  ;;  %v5078_v31 = vand.u32 4294901760, %v3483_v3  ;;  %v3505_v47 = vsub.f32 %v3462_v13, %v5076_v2 }
  0x45   :  { %v3491_v10 = vsub.f32 %v3442_v60, %v999_v26  ;;  %v3510_v60 = vsub.f32 %v3468_v21, %v5074_v4  ;;  %v5079_v59 = vand.u32 4294901760, %v3488_v42 }
  0x46   :  { %400 = vmatmul.mubr.f32.vlgmr.msra.gmra.mrb[0].mxu0 %v3165_v48  ;;  %5364 = vst [vmem:[#allocation28_spill] sm:$0xff] %v3505_v47  ;;  %v3524_v40 = vsub.f32 %v3483_v3, %v5078_v31  ;;  %v5083_v4 = vand.u32 4294901760, %v3505_v47  ;;  %v3573_v48 = vld [vmem:[%s5008_s3 + $0x40] sm:$0xff] }
  0x47   :  { %2387 = vmatpush1.bf16.msra.mxu0 %v2386_v61  ;;  %534 = vmatprep.mubr.f32.mxu0 %v5360_v50  ;;  %5361 = vst [vmem:[#allocation19_spill] sm:$0xff] %v3491_v10  ;;  %v3494_v61 = vsub.f32 %v3447_v0, %v1003_v32  ;;  %5365 = vst [vmem:[#allocation29_spill] sm:$0xff] %v3510_v60  ;;  %v3515_v0 = vsub.f32 %v3473_v45, %v5075_v16  ;;  %v5080_v53 = vand.u32 4294901760, %v3491_v10 }
  0x48   :  { %2389 = vmatprep.subr.bf16.mxu0 %v2388_v28  ;;  %v3499_v28 = vsub.f32 %v3452_v1, %v5077_v25  ;;  %5367 = vst [vmem:[#allocation31_spill] sm:$0xff] %v3524_v40  ;;  %v5086_v16 = vand.u32 4294901760, %v3510_v60  ;;  %v1165_v37 = vsub.f32 %v3505_v47, %v5083_v4 }
  0x49   :  { %5362 = vst [vmem:[#allocation21_spill] sm:$0xff] %v3494_v61  ;;  %5366 = vst [vmem:[#allocation30_spill] sm:$0xff] %v3515_v0  ;;  %v5081_v51 = vand.u32 4294901760, %v3494_v61  ;;  %v5089_v2 = vand.u32 4294901760, %v3515_v0  ;;  %v1147_v25 = vsub.f32 %v3491_v10, %v5080_v53 }
  0x4a   :  { %5363 = vst [vmem:[#allocation22_spill] sm:$0xff] %v3499_v28  ;;  %v5082_v41 = vand.u32 4294901760, %v3499_v28 }
  0x4b   :  { %2391 = vmatpush1.bf16.msra.mxu0 %v2390_v55  ;;  %v3532_v55 = vsub.f32 %v3488_v42, %v5079_v59  ;;  %v1159_v31 = vsub.f32 %v3494_v61, %v5081_v51  ;;  %v1171_v59 = vsub.f32 %v3510_v60, %v5086_v16  ;;  %v1183_v53 = vsub.f32 %v3515_v0, %v5089_v2 }
  0x4c   :  { %2393 = vmatprep.subr.bf16.mxu0 %v2392_v39  ;;  %v1153_v39 = vsub.f32 %v3499_v28, %v5082_v41  ;;  %v3557_v41 = vld [vmem:[%s5008_s3 + $0x48] sm:$0xff]  ;;  %v1148_v4 = vand.u32 4294901760, %v1147_v25  ;;  %v5369_v60 = vand.u32 4294901760, %v3524_v40  ;;  %v1166_v51 = vand.u32 4294901760, %v1165_v37 }
  0x4d   :  { %5368 = vst [vmem:[#allocation32_spill] sm:$0xff] %v3532_v55  ;;  %v1160_v47 = vand.u32 4294901760, %v1159_v31  ;;  %v1172_v0 = vand.u32 4294901760, %v1171_v59  ;;  %v1184_v28 = vand.u32 4294901760, %v1183_v53  ;;  %v5370_v61 = vand.u32 4294901760, %v3532_v55  ;;  %v3585_v53 = vld [vmem:[%s5008_s3 + $0x68] sm:$0xff] }
  0x4e   :  { %v1154_v16 = vand.u32 4294901760, %v1153_v39  ;;  %v1177_v2 = vsub.f32 %v3524_v40, %v5369_v60  ;;  %v5102_v37 = vand.u32 4294901760, %v3562_v38  ;;  %v3590_v59 = vld [vmem:[%s5008_s3 + $0x78] sm:$0xff] }
  0x4f   :  { %2395 = vmatpush1.bf16.msra.mxu0 %v2394_v7  ;;  %v1189_v10 = vsub.f32 %v3532_v55, %v5370_v61  ;;  %v3578_v7 = vld [vmem:[%s5008_s3 + $0x50] sm:$0xff]  ;;  %v2576_v25 = vpack.c.bf16 %v1160_v47, %v1148_v4  ;;  %v2580_v60 = vpack.c.bf16 %v1184_v28, %v1172_v0  ;;  %v3592_v55 = vpack.c.bf16 %v1003_v32, %v999_v26 }
  0x50   :  { %2397 = vmatprep.subr.bf16.mxu0 %v2396_v36  ;;  %v1178_v31 = vand.u32 4294901760, %v1177_v2  ;;  %v5115_v36 = vand.u32 4294901760, %v3557_v41  ;;  %v2578_v61 = vpack.c.bf16 %v1166_v51, %v1154_v16  ;;  %v5371_v47 = vpack.c.bf16 %v3124_v17, %v3122_v15  ;;  %v3612_v15 = vld [vmem:[%s5008_s3 + $0x60] sm:$0xff] }
  0x51   :  { %v1190_v39 = vand.u32 4294901760, %v1189_v10  ;;  %2577 = vmatprep.subr.bf16.mxu1 %v2576_v25  ;;  %v3605_v4 = vsub.f32 %v3562_v38, %v5102_v37  ;;  %v5114_v51 = vand.u32 4294901760, %v3573_v48  ;;  %v5113_v26 = vand.u32 4294901760, %v3578_v7 }
  0x52   :  { %v3600_v2 = vsub.f32 %v3557_v41, %v5115_v36  ;;  %v5374_v17 = vpack.c.bf16 %v3128_v19, %v3126_v18  ;;  %2579 = vmatpush1.bf16.msra.mxu1 %v2578_v61  ;;  %v5375_v16 = vand.u32 4294901760, %v3452_v1  ;;  %v5376_v10 = vand.u32 4294901760, %v3462_v13  ;;  %v3640_v1 = vld [vmem:[%s5008_s3 + $0x70] sm:$0xff]  ;;  %v3721_v36 = vld [vmem:[%s5008_s3 + $0x80] sm:$0xff] }
  0x53   :  { %2399 = vmatpush1.bf16.msra.mxu0 %v5371_v47  ;;  %5373 = vst [vmem:[#allocation34_spill] sm:$0xff] %v3605_v4  ;;  %v2582_v32 = vpack.c.bf16 %v1190_v39, %v1178_v31  ;;  %v5106_v0 = vand.u32 4294901760, %v3585_v53  ;;  %v5103_v25 = vand.u32 4294901760, %v3590_v59  ;;  %2581 = vmatprep.subr.bf16.mxu1 %v2580_v60  ;;  %v5104_v37 = vand.u32 4294901760, %v3605_v4 }
  0x54   :  { %5372 = vst [vmem:[#allocation33_spill] sm:$0xff] %v3600_v2  ;;  %2401 = vmatprep.subr.bf16.mxu0 %v5374_v17  ;;  %v3621_v28 = vpack.c.bf16 %v5376_v10, %v5375_v16  ;;  %v5105_v47 = vand.u32 4294901760, %v3600_v2  ;;  %v3630_v18 = vsub.f32 %v3573_v48, %v5114_v51  ;;  %v3635_v19 = vsub.f32 %v3578_v7, %v5113_v26 }
  0x55   :  { %v3645_v13 = vsub.f32 %v3585_v53, %v5106_v0  ;;  %v3650_v31 = vsub.f32 %v3590_v59, %v5103_v25  ;;  %v5381_v61 = vand.u32 4294901760, %v3468_v21  ;;  %v5382_v60 = vand.u32 4294901760, %v3473_v45 }
  0x56   :  { %5377 = vst [vmem:[#allocation35_spill] sm:$0xff] %v3630_v18  ;;  %5378 = vst [vmem:[#allocation36_spill] sm:$0xff] %v3635_v19  ;;  %v5111_v17 = vand.u32 4294901760, %v3612_v15  ;;  %v5383_v16 = vpack.c.bf16 %v3138_v27, %v3132_v23  ;;  %v1195_v10 = vsub.f32 %v3600_v2, %v5105_v47  ;;  %v1207_v25 = vsub.f32 %v3605_v4, %v5104_v37  ;;  %v5451_v4 = vld [vmem:[#allocation12_spill] sm:$0xff] }
  0x57   :  { %5379 = vst [vmem:[#allocation37_spill] sm:$0xff] %v3645_v13  ;;  %5380 = vst [vmem:[#allocation38_spill] sm:$0xff] %v3650_v31  ;;  %v3656_v39 = vpack.c.bf16 %v5382_v60, %v5381_v61  ;;  %v5110_v21 = vand.u32 4294901760, %v3630_v18  ;;  %v5109_v45 = vand.u32 4294901760, %v3635_v19  ;;  %v5384_v61 = vpack.c.bf16 %v3144_v30, %v3142_v29  ;;  %2583 = vmatpush1.bf16.msra.mxu1 %v2582_v32 }
  0x58   :  { %2403 = vmatpush1.bf16.msra.mxu0 %v5383_v16  ;;  %v5107_v23 = vand.u32 4294901760, %v3645_v13  ;;  %v5108_v27 = vand.u32 4294901760, %v3650_v31  ;;  %v5112_v60 = vand.u32 4294901760, %v3640_v1  ;;  %v3679_v16 = vsub.f32 %v3612_v15, %v5111_v17 }
  0x59   :  { %2405 = vmatprep.subr.bf16.mxu0 %v5384_v61  ;;  %v1196_v37 = vand.u32 4294901760, %v1195_v10  ;;  %v1208_v47 = vand.u32 4294901760, %v1207_v25  ;;  %v1201_v0 = vsub.f32 %v3630_v18, %v5110_v21  ;;  %v1213_v29 = vsub.f32 %v3635_v19, %v5109_v45  ;;  %v3702_v10 = vld [vmem:[%s5008_s3 + $0x88] sm:$0xff] }
  0x5a   :  { %5385 = vst [vmem:[#allocation39_spill] sm:$0xff] %v3679_v16  ;;  %v1219_v30 = vsub.f32 %v3645_v13, %v5107_v23  ;;  %v1231_v32 = vsub.f32 %v3650_v31, %v5108_v27  ;;  %v3697_v25 = vsub.f32 %v3640_v1, %v5112_v60  ;;  %v3707_v23 = vld [vmem:[%s5008_s3 + $0x98] sm:$0xff]  ;;  %v5387_v27 = vpack.c.bf16 %v3151_v34, %v3149_v33 }
  0x5b   :  { %v2584_v45 = vpack.c.bf16 %v1208_v47, %v1196_v37  ;;  %v1202_v21 = vand.u32 4294901760, %v1201_v0  ;;  %v1214_v17 = vand.u32 4294901760, %v1213_v29  ;;  %v5388_v60 = vand.u32 4294901760, %v3483_v3  ;;  %v3746_v29 = vld [vmem:[%s5008_s3 + $0xa8] sm:$0xff] }
  0x5c   :  { %5386 = vst [vmem:[#allocation40_spill] sm:$0xff] %v3697_v25  ;;  %2407 = vmatpush1.bf16.msra.mxu0 %v5387_v27  ;;  %v5389_v26 = vand.u32 4294901760, %v3488_v42  ;;  %v5390_v61 = vpack.c.bf16 %v5357_v52, %v3158_v44  ;;  %v1220_v33 = vand.u32 4294901760, %v1219_v30  ;;  %v1232_v34 = vand.u32 4294901760, %v1231_v32  ;;  %v3733_v42 = vld [vmem:[%s5008_s3 + $0x90] sm:$0xff] }
  0x5d   :  { %v5391_v37 = vand.u32 4294901760, %v3679_v16  ;;  %v5116_v3 = vand.u32 4294901760, %v3697_v25  ;;  %2585 = vmatprep.subr.bf16.mxu1 %v2584_v45  ;;  %v5127_v47 = vand.u32 4294901760, %v3702_v10  ;;  %v5124_v44 = vand.u32 4294901760, %v3707_v23  ;;  %v3751_v45 = vld [vmem:[%s5008_s3 + $0xb8] sm:$0xff] }
  0x5e   :  { %v3716_v51 = vpack.c.bf16 %v5389_v26, %v5388_v60  ;;  %2409 = vmatprep.subr.bf16.mxu0 %v5390_v61  ;;  %v2586_v26 = vpack.c.bf16 %v1214_v17, %v1202_v21  ;;  %v5392_v52 = vand.u32 4294901760, %v3557_v41  ;;  %v5393_v27 = vand.u32 4294901760, %v3562_v38 }
  0x5f   :  { %v1225_v0 = vsub.f32 %v3679_v16, %v5391_v37  ;;  %v2588_v17 = vpack.c.bf16 %v1232_v34, %v1220_v33  ;;  %v1237_v41 = vsub.f32 %v3697_v25, %v5116_v3  ;;  %v5123_v38 = vand.u32 4294901760, %v3721_v36 }
  0x60   :  { %v3741_v60 = vpack.c.bf16 %v5393_v27, %v5392_v52  ;;  %v5394_v30 = vpack.c.bf16 %v5359_v58, %v5358_v57  ;;  %2587 = vmatpush1.bf16.msra.mxu1 %v2586_v26  ;;  %v3763_v32 = vsub.f32 %v3702_v10, %v5127_v47  ;;  %v3768_v61 = vsub.f32 %v3707_v23, %v5124_v44  ;;  %v5413_v47 = vld [vmem:[#allocation6_spill] sm:$0xff] }
  0x61   :  { %v1226_v21 = vand.u32 4294901760, %v1225_v0  ;;  %v5120_v33 = vand.u32 4294901760, %v3733_v42  ;;  %v5397_v34 = vand.u32 4294901760, %v3573_v48  ;;  %v5398_v37 = vand.u32 4294901760, %v3578_v7  ;;  %2589 = vmatprep.subr.bf16.mxu1 %v2588_v17  ;;  %v3790_v48 = vld [vmem:[%s5008_s3 + $0xa0] sm:$0xff] }
  0x62   :  { %2411 = vmatpush1.bf16.msra.mxu0 %v5394_v30  ;;  %5395 = vst [vmem:[#allocation41_spill] sm:$0xff] %v3763_v32  ;;  %5396 = vst [vmem:[#allocation42_spill] sm:$0xff] %v3768_v61  ;;  %v5400_v57 = vpack.c.bf16 %v3220_v24, %v3218_v62  ;;  %v1238_v58 = vand.u32 4294901760, %v1237_v41  ;;  %v3783_v26 = vsub.f32 %v3721_v36, %v5123_v38  ;;  %v5117_v52 = vand.u32 4294901760, %v3746_v29  ;;  %v5411_v38 = vld [vmem:[#allocation23_spill] sm:$0xff] }
  0x63   :  { %v3775_v0 = vpack.c.bf16 %v5398_v37, %v5397_v34  ;;  %v5119_v27 = vand.u32 4294901760, %v3751_v45  ;;  %v5118_v7 = vand.u32 4294901760, %v3763_v32  ;;  %v5121_v62 = vand.u32 4294901760, %v3768_v61  ;;  %v3808_v34 = vld [vmem:[%s5008_s3 + $0xb0] sm:$0xff] }
  0x64   :  { %2413 = vmatprep.subr.bf16.mxu0 %v5400_v57  ;;  %5401 = vst [vmem:[#allocation44_spill] sm:$0xff] %v3783_v26  ;;  %v3797_v24 = vsub.f32 %v3733_v42, %v5120_v33  ;;  %v5403_v17 = vand.u32 4294901760, %v3585_v53  ;;  %v5404_v41 = vand.u32 4294901760, %v3590_v59  ;;  %v2590_v37 = vpack.c.bf16 %v1238_v58, %v1226_v21 }
  0x65   :  { %5399 = vst [vmem:[#allocation43_spill] sm:$0xff] %v3775_v0  ;;  %v5122_v57 = vand.u32 4294901760, %v3783_v26  ;;  %v3814_v3 = vsub.f32 %v3746_v29, %v5117_v52  ;;  %v3819_v53 = vsub.f32 %v3751_v45, %v5119_v27  ;;  %v5408_v59 = vpack.c.bf16 %v3291_v9, %v3263_v35  ;;  %v5409_v52 = vld [vmem:[#allocation5_spill] sm:$0xff] }
  0x66   :  { %5402 = vst [vmem:[#allocation45_spill] sm:$0xff] %v3797_v24  ;;  %v3803_v30 = vpack.c.bf16 %v5404_v41, %v5403_v17  ;;  %v1243_v21 = vsub.f32 %v3763_v32, %v5118_v7  ;;  %v1255_v58 = vsub.f32 %v3768_v61, %v5121_v62  ;;  %v5125_v17 = vand.u32 4294901760, %v3797_v24  ;;  %2591 = vmatpush1.bf16.msra.mxu1 %v2590_v37 }
  0x67   :  { %5406 = vst [vmem:[#allocation47_spill] sm:$0xff] %v3814_v3  ;;  %5407 = vst [vmem:[#allocation48_spill] sm:$0xff] %v3819_v53  ;;  %2415 = vmatpush1.bf16.msra.mxu0 %v5408_v59  ;;  %v5126_v41 = vand.u32 4294901760, %v3790_v48  ;;  %v1249_v35 = vsub.f32 %v3783_v26, %v5122_v57  ;;  %v5128_v9 = vand.u32 4294901760, %v3814_v3  ;;  %v5131_v59 = vand.u32 4294901760, %v3819_v53  ;;  %v3850_v57 = vld [vmem:[%s5008_s3 + $0xc8] sm:$0xff] }
  0x68   :  { %5405 = vst [vmem:[#allocation46_spill] sm:$0xff] %v3803_v30  ;;  %2417 = vmatprep.subr.bf16.mxu0 %v5409_v52  ;;  %v5136_v7 = vand.u32 4294901760, %v3808_v34  ;;  %v1244_v27 = vand.u32 4294901760, %v1243_v21  ;;  %v1256_v33 = vand.u32 4294901760, %v1255_v58  ;;  %v1261_v62 = vsub.f32 %v3797_v24, %v5125_v17  ;;  %v5417_v26 = vld [vmem:[#allocation7_spill] sm:$0xff] }
  0x69   :  { %v3845_v37 = vsub.f32 %v3790_v48, %v5126_v41  ;;  %v1250_v44 = vand.u32 4294901760, %v1249_v35  ;;  %v1267_v21 = vsub.f32 %v3814_v3, %v5128_v9  ;;  %v1279_v58 = vsub.f32 %v3819_v53, %v5131_v59  ;;  %v3867_v41 = vld [vmem:[%s5008_s3 + $0xd8] sm:$0xff] }
  0x6a   :  { %537 = vmatmul.mubr.f32.vlgmr.msra.gmra.mrb[0].mxu0 %v5411_v38  ;;  %v3862_v17 = vsub.f32 %v3808_v34, %v5136_v7  ;;  %v2592_v35 = vpack.c.bf16 %v1256_v33, %v1244_v27  ;;  %v1262_v9 = vand.u32 4294901760, %v1261_v62  ;;  %v5414_v59 = vand.u32 4294901760, %v3612_v15  ;;  %v3881_v7 = vld [vmem:[%s5008_s3 + $0xc0] sm:$0xff]  ;;  %v3889_v15 = vld [vmem:[%s5008_s3 + $0xd0] sm:$0xff]  ;;  %v3904_v27 = vld [vmem:[%s5008_s3 + $0xe8] sm:$0xff] }
  0x6b   :  { %5410 = vst [vmem:[#allocation5_spill] sm:$0xff] %v3845_v37  ;;  %2419 = vmatpush1.bf16.msra.mxu0 %v5413_v47  ;;  %639 = vmatprep.mubr.f32.mxu0 %v5360_v50  ;;  %v5143_v3 = vand.u32 4294901760, %v3845_v37  ;;  %v5415_v53 = vand.u32 4294901760, %v3640_v1  ;;  %v1268_v61 = vand.u32 4294901760, %v1267_v21  ;;  %v1280_v32 = vand.u32 4294901760, %v1279_v58 }
  0x6c   :  { %5412 = vst [vmem:[#allocation23_spill] sm:$0xff] %v3862_v17  ;;  %2421 = vmatprep.subr.bf16.mxu0 %v5417_v26  ;;  %2593 = vmatprep.subr.bf16.mxu1 %v2592_v35  ;;  %v2594_v1 = vpack.c.bf16 %v1262_v9, %v1250_v44  ;;  %v5419_v21 = vand.u32 4294901760, %v3707_v23  ;;  %v5421_v44 = vand.u32 4294901760, %v3862_v17  ;;  %v5422_v35 = vand.u32 4294901760, %v3850_v57  ;;  %v3918_v23 = vld [vmem:[%s5008_s3 + $0xf8] sm:$0xff] }
  0x6d   :  { %v3876_v24 = vpack.c.bf16 %v5415_v53, %v5414_v59  ;;  %v1273_v62 = vsub.f32 %v3845_v37, %v5143_v3  ;;  %v5150_v53 = vand.u32 4294901760, %v3867_v41  ;;  %v5418_v59 = vand.u32 4294901760, %v3702_v10 }
  0x6e   :  { %v2596_v33 = vpack.c.bf16 %v1280_v32, %v1268_v61  ;;  %v1285_v9 = vsub.f32 %v3862_v17, %v5421_v44  ;;  %v3912_v3 = vsub.f32 %v3850_v57, %v5422_v35  ;;  %2595 = vmatpush1.bf16.msra.mxu1 %v2594_v1  ;;  %v5426_v44 = vand.u32 4294901760, %v3721_v36  ;;  %v5429_v17 = vld [vmem:[#allocation9_spill] sm:$0xff] }
  0x6f   :  { %5416 = vst [vmem:[#allocation6_spill] sm:$0xff] %v3876_v24  ;;  %v3899_v58 = vpack.c.bf16 %v5419_v21, %v5418_v59  ;;  %v5424_v59 = vld [vmem:[#allocation8_spill] sm:$0xff]  ;;  %v1274_v32 = vand.u32 4294901760, %v1273_v62  ;;  %v3924_v61 = vsub.f32 %v3867_v41, %v5150_v53  ;;  %v5153_v21 = vand.u32 4294901760, %v3889_v15  ;;  %v3962_v53 = vld [vmem:[%s5008_s3 + $0xf0] sm:$0xff] }
  0x70   :  { %5423 = vst [vmem:[#allocation49_spill] sm:$0xff] %v3912_v3  ;;  %2423 = vmatpush1.bf16.msra.mxu0 %v5424_v59  ;;  %v5427_v35 = vand.u32 4294901760, %v3733_v42  ;;  %2597 = vmatprep.subr.bf16.mxu1 %v2596_v33  ;;  %v1286_v37 = vand.u32 4294901760, %v1285_v9  ;;  %v5430_v62 = vand.u32 4294901760, %v3881_v7  ;;  %v3944_v36 = vld [vmem:[%s5008_s3 + $0xe0] sm:$0xff]  ;;  %v5436_v42 = vand.u32 4294901760, %v3912_v3 }
  0x71   :  { %5420 = vst [vmem:[#allocation7_spill] sm:$0xff] %v3899_v58  ;;  %5425 = vst [vmem:[#allocation8_spill] sm:$0xff] %v3924_v61  ;;  %2425 = vmatprep.subr.bf16.mxu0 %v5429_v17  ;;  %v3950_v33 = vsub.f32 %v3889_v15, %v5153_v21  ;;  %v5437_v9 = vand.u32 4294901760, %v3904_v27  ;;  %v5443_v21 = vld [vmem:[#allocation11_spill] sm:$0xff]  ;;  %v5448_v18 = vand.u32 4294901760, %v3790_v48  ;;  %v5453_v48 = vld [vmem:[#allocation13_spill] sm:$0xff] }
  0x72   :  { %v3931_v10 = vpack.c.bf16 %v5427_v35, %v5426_v44  ;;  %v3938_v25 = vsub.f32 %v3881_v7, %v5430_v62  ;;  %v5433_v44 = vand.u32 4294901760, %v3746_v29  ;;  %v5434_v35 = vand.u32 4294901760, %v3751_v45  ;;  %v5439_v45 = vld [vmem:[#allocation10_spill] sm:$0xff] }
  0x73   :  { %5432 = vst [vmem:[#allocation51_spill] sm:$0xff] %v3950_v33  ;;  %v2598_v1 = vpack.c.bf16 %v1286_v37, %v1274_v32  ;;  %v1291_v16 = vsub.f32 %v3912_v3, %v5436_v42  ;;  %v3971_v29 = vsub.f32 %v3904_v27, %v5437_v9  ;;  %v5441_v37 = vand.u32 4294901760, %v3918_v23 }
  0x74   :  { %5428 = vst [vmem:[#allocation50_spill] sm:$0xff] %v3931_v10  ;;  %5431 = vst [vmem:[#allocation9_spill] sm:$0xff] %v3938_v25  ;;  %v3957_v62 = vpack.c.bf16 %v5434_v35, %v5433_v44  ;;  %2427 = vmatpush1.bf16.msra.mxu0 %v5439_v45  ;;  %v5440_v44 = vand.u32 4294901760, %v3924_v61  ;;  %v5166_v42 = vand.u32 4294901760, %v3944_v36  ;;  %v5444_v3 = vand.u32 4294901760, %v3938_v25 }
  0x75   :  { %5438 = vst [vmem:[#allocation53_spill] sm:$0xff] %v3971_v29  ;;  %v3981_v32 = vsub.f32 %v3918_v23, %v5441_v37  ;;  %2429 = vmatprep.subr.bf16.mxu0 %v5443_v21  ;;  %2599 = vmatpush1.bf16.msra.mxu1 %v2598_v1  ;;  %v1292_v9 = vand.u32 4294901760, %v1291_v16  ;;  %v5178_v19 = vand.u32 4294901760, %v3971_v29  ;;  %v4002_v16 = vld [vmem:[%s5008_s3 + $0x108] sm:$0xff] }
  0x76   :  { %5435 = vst [vmem:[#allocation52_spill] sm:$0xff] %v3957_v62  ;;  %v1303_v35 = vsub.f32 %v3924_v61, %v5440_v44  ;;  %v1297_v13 = vsub.f32 %v3938_v25, %v5444_v3  ;;  %v5179_v44 = vand.u32 4294901760, %v3962_v53  ;;  %v5445_v61 = vand.u32 4294901760, %v3950_v33  ;;  %v4007_v3 = vld [vmem:[%s5008_s3 + $0x118] sm:$0xff] }
  0x77   :  { %5442 = vst [vmem:[#allocation10_spill] sm:$0xff] %v3981_v32  ;;  %v3997_v1 = vsub.f32 %v3944_v36, %v5166_v42 }
  0x78   :  { %v1304_v31 = vand.u32 4294901760, %v1303_v35  ;;  %v1309_v37 = vsub.f32 %v3950_v33, %v5445_v61  ;;  %v1298_v35 = vand.u32 4294901760, %v1297_v13  ;;  %v1315_v61 = vsub.f32 %v3971_v29, %v5178_v19  ;;  %2431 = vmatpush1.bf16.msra.mxu0 %v5451_v4 }
  0x79   :  { %5446 = vst [vmem:[#allocation11_spill] sm:$0xff] %v3997_v1  ;;  %v4015_v42 = vsub.f32 %v3962_v53, %v5179_v44  ;;  %v5449_v33 = vand.u32 4294901760, %v3808_v34  ;;  %v5452_v13 = vand.u32 4294901760, %v3981_v32  ;;  %v5185_v19 = vand.u32 4294901760, %v3997_v1  ;;  %v4031_v44 = vld [vmem:[%s5008_s3 + $0x100] sm:$0xff]  ;;  %2433 = vmatprep.subr.bf16.mxu0 %v5453_v48 }
  0x7a   :  { %v2600_v2 = vpack.c.bf16 %v1304_v31, %v1292_v9  ;;  %v1310_v40 = vand.u32 4294901760, %v1309_v37  ;;  %v1316_v34 = vand.u32 4294901760, %v1315_v61  ;;  %v4040_v9 = vld [vmem:[%s5008_s3 + $0x110] sm:$0xff]  ;;  %v5454_v61 = vand.u32 4294901760, %v3850_v57 }
  0x7b   :  { %5447 = vst [vmem:[#allocation54_spill] sm:$0xff] %v4015_v42  ;;  %v4021_v25 = vpack.c.bf16 %v5449_v33, %v5448_v18  ;;  %v1327_v62 = vsub.f32 %v3981_v32, %v5452_v13  ;;  %v1321_v32 = vsub.f32 %v3997_v1, %v5185_v19  ;;  %v5455_v18 = vand.u32 4294901760, %v3867_v41  ;;  %v4068_v41 = vld [vmem:[%s5008_s3 + $0x128] sm:$0xff] }
  0x7c   :  { %2601 = vmatprep.subr.bf16.mxu1 %v2600_v2  ;;  %v2602_v37 = vpack.c.bf16 %v1310_v40, %v1298_v35  ;;  %v5457_v31 = vand.u32 4294901760, %v4015_v42  ;;  %v5460_v40 = vand.u32 4294901760, %v4007_v3  ;;  %v4073_v35 = vld [vmem:[%s5008_s3 + $0x138] sm:$0xff]  ;;  %v5464_v19 = vand.u32 4294901760, %v3889_v15 }
  0x7d   :  { %5450 = vst [vmem:[#allocation55_spill] sm:$0xff] %v4021_v25  ;;  %v1328_v13 = vand.u32 4294901760, %v1327_v62  ;;  %v4049_v29 = vpack.c.bf16 %v5455_v18, %v5454_v61  ;;  %v5458_v25 = vand.u32 4294901760, %v4002_v16  ;;  %v5462_v18 = vld [vmem:[#allocation14_spill] sm:$0xff]  ;;  %v5193_v61 = vand.u32 4294901760, %v4040_v9 }
  0x7e   :  { %v1333_v33 = vsub.f32 %v4015_v42, %v5457_v31  ;;  %v4062_v62 = vsub.f32 %v4007_v3, %v5460_v40  ;;  %2435 = vmatpush1.bf16.msra.mxu0 %v5462_v18  ;;  %2603 = vmatpush1.bf16.msra.mxu1 %v2602_v37  ;;  %v1322_v31 = vand.u32 4294901760, %v1321_v32  ;;  %v5463_v40 = vand.u32 4294901760, %v3881_v7  ;;  %v5466_v42 = vld [vmem:[#allocation15_spill] sm:$0xff]  ;;  %v4094_v7 = vld [vmem:[%s5008_s3 + $0x120] sm:$0xff] }
  0x7f   :  { %5456 = vst [vmem:[#allocation12_spill] sm:$0xff] %v4049_v29  ;;  %v4057_v2 = vsub.f32 %v4002_v16, %v5458_v25  ;;  %v2604_v25 = vpack.c.bf16 %v1328_v13, %v1316_v34  ;;  %2437 = vmatprep.subr.bf16.mxu0 %v5466_v42  ;;  %v5467_v58 = vand.u32 4294901760, %v4031_v44  ;;  %v5200_v15 = vand.u32 4294901760, %v4068_v41  ;;  %v4112_v13 = vld [vmem:[%s5008_s3 + $0x130] sm:$0xff]  ;;  %v5473_v32 = vld [vmem:[#allocation16_spill] sm:$0xff] }
  0x80   :  { %5461 = vst [vmem:[#allocation56_spill] sm:$0xff] %v4062_v62  ;;  %v4081_v57 = vpack.c.bf16 %v5464_v19, %v5463_v40  ;;  %v1334_v1 = vand.u32 4294901760, %v1333_v33  ;;  %v5195_v10 = vand.u32 4294901760, %v4062_v62  ;;  %v4099_v19 = vsub.f32 %v4040_v9, %v5193_v61 }
  0x81   :  { %5459 = vst [vmem:[#allocation13_spill] sm:$0xff] %v4057_v2  ;;  %v5194_v29 = vand.u32 4294901760, %v4057_v2  ;;  %v4089_v34 = vsub.f32 %v4031_v44, %v5467_v58  ;;  %2605 = vmatprep.subr.bf16.mxu1 %v2604_v25  ;;  %v5470_v33 = vand.u32 4294901760, %v3904_v27  ;;  %v5471_v58 = vand.u32 4294901760, %v3918_v23 }
  0x82   :  { %5465 = vst [vmem:[#allocation14_spill] sm:$0xff] %v4081_v57  ;;  %5469 = vst [vmem:[#allocation57_spill] sm:$0xff] %v4099_v19  ;;  %v2606_v25 = vpack.c.bf16 %v1334_v1, %v1322_v31  ;;  %v1351_v61 = vsub.f32 %v4062_v62, %v5195_v10  ;;  %2439 = vmatpush1.bf16.msra.mxu0 %v5473_v32  ;;  %v5475_v1 = vand.u32 4294901760, %v4073_v35 }
  0x83   :  { %5468 = vst [vmem:[#allocation15_spill] sm:$0xff] %v4089_v34  ;;  %v4107_v37 = vpack.c.bf16 %v5471_v58, %v5470_v33  ;;  %v1339_v40 = vsub.f32 %v4057_v2, %v5194_v29  ;;  %v4126_v33 = vsub.f32 %v4068_v41, %v5200_v15  ;;  %v5203_v58 = vand.u32 4294901760, %v4094_v7  ;;  %v5477_v29 = vld [vmem:[#allocation17_spill] sm:$0xff] }
  0x84   :  { %v4131_v31 = vsub.f32 %v4073_v35, %v5475_v1  ;;  %2441 = vmatprep.subr.bf16.mxu0 %v5477_v29  ;;  %2607 = vmatpush1.bf16.msra.mxu1 %v2606_v25  ;;  %v1352_v27 = vand.u32 4294901760, %v1351_v61  ;;  %v5478_v62 = vand.u32 4294901760, %v4089_v34  ;;  %v5211_v2 = vand.u32 4294901760, %v4112_v13  ;;  %v4152_v61 = vld [vmem:[%s5008_s3 + $0x148] sm:$0xff] }
  0x85   :  { %5472 = vst [vmem:[#allocation58_spill] sm:$0xff] %v4107_v37  ;;  %5474 = vst [vmem:[#allocation16_spill] sm:$0xff] %v4126_v33  ;;  %v1340_v10 = vand.u32 4294901760, %v1339_v40  ;;  %v5479_v15 = vand.u32 4294901760, %v4099_v19  ;;  %v4147_v25 = vsub.f32 %v4094_v7, %v5203_v58  ;;  %v5484_v58 = vand.u32 4294901760, %v3944_v36  ;;  %v4181_v36 = vld [vmem:[%s5008_s3 + $0x140] sm:$0xff] }
  0x86   :  { %5476 = vst [vmem:[#allocation59_spill] sm:$0xff] %v4131_v31  ;;  %v1345_v23 = vsub.f32 %v4089_v34, %v5478_v62  ;;  %5481 = vst [vmem:[#allocation60_spill] sm:$0xff] %v4152_v61  ;;  %v4157_v62 = vld [vmem:[%s5008_s3 + $0x158] sm:$0xff]  ;;  %v4162_v57 = vsub.f32 %v4112_v13, %v5211_v2  ;;  %v5485_v1 = vand.u32 4294901760, %v3962_v53  ;;  %v5488_v30 = vand.u32 4294901760, %v4126_v33 }
  0x87   :  { %v1357_v37 = vsub.f32 %v4099_v19, %v5479_v15  ;;  %5480 = vst [vmem:[#allocation17_spill] sm:$0xff] %v4147_v25  ;;  %5482 = vst [vmem:[#allocation61_spill] sm:$0xff] %v4157_v62  ;;  %v2608_v15 = vpack.c.bf16 %v1352_v27, %v1340_v10  ;;  %v5487_v34 = vld [vmem:[#allocation20_spill] sm:$0xff]  ;;  %v5489_v10 = vand.u32 4294901760, %v4131_v31 }
  0x88   :  { %v1346_v40 = vand.u32 4294901760, %v1345_v23  ;;  %5483 = vst [vmem:[#allocation62_spill] sm:$0xff] %v4162_v57  ;;  %v4168_v19 = vpack.c.bf16 %v5485_v1, %v5484_v58  ;;  %2443 = vmatpush1.bf16.msra.mxu0 %v5487_v34  ;;  %v1363_v0 = vsub.f32 %v4126_v33, %v5488_v30  ;;  %v5490_v53 = vld [vmem:[#allocation24_spill] sm:$0xff]  ;;  %v5491_v1 = vand.u32 4294901760, %v4002_v16  ;;  %v4196_v23 = vld [vmem:[%s5008_s3 + $0x150] sm:$0xff] }
  0x89   :  { %v1358_v24 = vand.u32 4294901760, %v1357_v37  ;;  %v1375_v27 = vsub.f32 %v4131_v31, %v5489_v10  ;;  %2445 = vmatprep.subr.bf16.mxu0 %v5490_v53  ;;  %2609 = vmatprep.subr.bf16.mxu1 %v2608_v15  ;;  %v5492_v10 = vand.u32 4294901760, %v4007_v3  ;;  %v5494_v37 = vand.u32 4294901760, %v4147_v25 }
  0x8a   :  { %5486 = vst [vmem:[#allocation63_spill] sm:$0xff] %v4168_v19  ;;  %v1364_v33 = vand.u32 4294901760, %v1363_v0  ;;  %v5495_v30 = vand.u32 4294901760, %v4162_v57  ;;  %v5496_v3 = vand.u32 4294901760, %v4152_v61  ;;  %v5500_v0 = vand.u32 4294901760, %v4040_v9 }
  0x8b   :  { %v4191_v2 = vpack.c.bf16 %v5492_v10, %v5491_v1  ;;  %v2610_v31 = vpack.c.bf16 %v1358_v24, %v1346_v40  ;;  %v1376_v15 = vand.u32 4294901760, %v1375_v27  ;;  %v1369_v58 = vsub.f32 %v4147_v25, %v5494_v37  ;;  %v4218_v24 = vld [vmem:[%s5008_s3 + $0x168] sm:$0xff]  ;;  %v4223_v40 = vld [vmem:[%s5008_s3 + $0x178] sm:$0xff] }
  0x8c   :  { %v1381_v16 = vsub.f32 %v4162_v57, %v5495_v30  ;;  %v4207_v1 = vsub.f32 %v4152_v61, %v5496_v3  ;;  %v5497_v10 = vand.u32 4294901760, %v4157_v62  ;;  %v5498_v27 = vld [vmem:[#allocation25_spill] sm:$0xff]  ;;  %v5230_v3 = vand.u32 4294901760, %v4196_v23 }
  0x8d   :  { %5493 = vst [vmem:[#allocation20_spill] sm:$0xff] %v4191_v2  ;;  %2447 = vmatpush1.bf16.msra.mxu0 %v5498_v27  ;;  %2611 = vmatpush1.bf16.msra.mxu1 %v2610_v31  ;;  %v2612_v37 = vpack.c.bf16 %v1376_v15, %v1364_v33  ;;  %v1370_v30 = vand.u32 4294901760, %v1369_v58  ;;  %v5502_v19 = vand.u32 4294901760, %v4181_v36  ;;  %v5227_v9 = vand.u32 4294901760, %v4218_v24 }
  0x8e   :  { %v4212_v2 = vsub.f32 %v4157_v62, %v5497_v10  ;;  %v5499_v10 = vand.u32 4294901760, %v4031_v44  ;;  %2449 = vmatprep.subr.bf16.mxu0 %v3332_v6  ;;  %v1382_v25 = vand.u32 4294901760, %v1381_v16  ;;  %v5225_v62 = vand.u32 4294901760, %v4207_v1  ;;  %v4244_v44 = vld [vmem:[%s5008_s3 + $0x160] sm:$0xff]  ;;  %v4262_v16 = vld [vmem:[%s5008_s3 + $0x170] sm:$0xff] }
  0x8f   :  { %v4239_v33 = vsub.f32 %v4181_v36, %v5502_v19  ;;  %2613 = vmatprep.subr.bf16.mxu1 %v2612_v37  ;;  %v4249_v6 = vsub.f32 %v4196_v23, %v5230_v3  ;;  %v5226_v31 = vand.u32 4294901760, %v4223_v40  ;;  %v5503_v58 = vand.u32 4294901760, %v4068_v41 }
  0x90   :  { %v4231_v57 = vpack.c.bf16 %v5500_v0, %v5499_v10  ;;  %v5224_v61 = vand.u32 4294901760, %v4212_v2  ;;  %v5504_v19 = vand.u32 4294901760, %v4073_v35  ;;  %v5506_v0 = vand.u32 4294901760, %v5411_v38 }
  0x91   :  { %v2614_v37 = vpack.c.bf16 %v1382_v25, %v1370_v30  ;;  %v1387_v10 = vsub.f32 %v4207_v1, %v5225_v62  ;;  %v5228_v35 = vand.u32 4294901760, %v4239_v33  ;;  %v4279_v38 = vsub.f32 %v4218_v24, %v5227_v9 }
  0x92   :  { %5501 = vst [vmem:[#allocation24_spill] sm:$0xff] %v4231_v57  ;;  %v4257_v15 = vpack.c.bf16 %v5504_v19, %v5503_v58  ;;  %643 = vmatmul.mubr.f32.vlgmr.msra.gmra.mrb[0].mxu0 %v5506_v0  ;;  %v1399_v41 = vsub.f32 %v4212_v2, %v5224_v61  ;;  %v5229_v58 = vand.u32 4294901760, %v4249_v6  ;;  %v4284_v25 = vsub.f32 %v4223_v40, %v5226_v31 }
  0x93   :  { %2451 = vmatpush1.bf16.msra.mxu0 %v3338_v8  ;;  %809 = vmatprep.mubr.f32.mxu0 %v5360_v50  ;;  %v5231_v30 = vand.u32 4294901760, %v4244_v44  ;;  %v1388_v8 = vand.u32 4294901760, %v1387_v10  ;;  %v1393_v0 = vsub.f32 %v4239_v33, %v5228_v35  ;;  %v5245_v61 = vand.u32 4294901760, %v4262_v16 }
  0x94   :  { %5505 = vst [vmem:[#allocation25_spill] sm:$0xff] %v4257_v15  ;;  %2453 = vmatprep.subr.bf16.mxu0 %v3344_v49  ;;  %2615 = vmatpush1.bf16.msra.mxu1 %v2614_v37  ;;  %v1400_v19 = vand.u32 4294901760, %v1399_v41  ;;  %v1405_v62 = vsub.f32 %v4249_v6, %v5229_v58  ;;  %v5232_v31 = vand.u32 4294901760, %v4279_v38  ;;  %v5507_v35 = vand.u32 4294901760, %v4094_v7 }
  0x95   :  { %v4300_v49 = vsub.f32 %v4244_v44, %v5231_v30  ;;  %v1394_v10 = vand.u32 4294901760, %v1393_v0  ;;  %v4305_v41 = vsub.f32 %v4262_v16, %v5245_v61  ;;  %v5508_v58 = vand.u32 4294901760, %v4112_v13 }
  0x96   :  { %v2616_v37 = vpack.c.bf16 %v1400_v19, %v1388_v8  ;;  %v1406_v9 = vand.u32 4294901760, %v1405_v62  ;;  %v1411_v30 = vsub.f32 %v4279_v38, %v5232_v31  ;;  %v5510_v8 = vand.u32 4294901760, %v4284_v25 }
  0x97   :  { %v4311_v3 = vpack.c.bf16 %v5508_v58, %v5507_v35  ;;  %2455 = vmatpush1.bf16.msra.mxu0 %v3350_v43  ;;  %v5234_v0 = vand.u32 4294901760, %v4300_v49  ;;  %v5233_v7 = vand.u32 4294901760, %v4305_v41 }
  0x98   :  { %v1423_v19 = vsub.f32 %v4284_v25, %v5510_v8  ;;  %2457 = vmatprep.subr.bf16.mxu0 %v3356_v11  ;;  %2617 = vmatprep.subr.bf16.mxu1 %v2616_v37  ;;  %v2618_v13 = vpack.c.bf16 %v1406_v9, %v1394_v10  ;;  %v1412_v35 = vand.u32 4294901760, %v1411_v30  ;;  %v5511_v30 = vld [vmem:[#allocation26_spill] sm:$0xff]  ;;  %v5512_v37 = vld [vmem:[#allocation27_spill] sm:$0xff] }
  0x99   :  { %5509 = vst [vmem:[#allocation64_spill] sm:$0xff] %v4311_v3  ;;  %v1417_v43 = vsub.f32 %v4300_v49, %v5234_v0  ;;  %v1429_v62 = vsub.f32 %v4305_v41, %v5233_v7 }
  0x9a   :  { %v1424_v58 = vand.u32 4294901760, %v1423_v19  ;;  %2619 = vmatpush1.bf16.msra.mxu1 %v2618_v13 }
  0x9b   :  { %2459 = vmatpush1.bf16.msra.mxu0 %v3362_v14  ;;  %v1418_v31 = vand.u32 4294901760, %v1417_v43  ;;  %v1430_v11 = vand.u32 4294901760, %v1429_v62  ;;  %v5513_v14 = vld [vmem:[#allocation18_spill] sm:$0xff] }
  0x9c   :  { %v2620_v8 = vpack.c.bf16 %v1424_v58, %v1412_v35  ;;  %2461 = vmatprep.subr.bf16.mxu0 %v3368_v56  ;;  %v5514_v56 = vld [vmem:[#allocation43_spill] sm:$0xff]  ;;  %v4440_v58 = vld [vmem:[%s5008_s3 + $0x1a0] sm:$0xff] }
  0x9d   :  { %v2622_v9 = vpack.c.bf16 %v1430_v11, %v1418_v31  ;;  %v4431_v31 = vld [vmem:[%s5008_s3 + $0x1b8] sm:$0xff]  ;;  %v4445_v43 = vld [vmem:[%s5008_s3 + $0x1b0] sm:$0xff]  ;;  %v5246_v11 = vand.u32 4294901760, %v4440_v58 }
  0x9e   :  { %2621 = vmatprep.subr.bf16.mxu1 %v2620_v8  ;;  %v5238_v35 = vand.u32 4294901760, %v4431_v31 }
  0x9f   :  { %2463 = vmatpush1.bf16.msra.mxu0 %v3374_v54  ;;  %2623 = vmatpush1.bf16.msra.mxu1 %v2622_v9  ;;  %v5515_v54 = vld [vmem:[#allocation46_spill] sm:$0xff]  ;;  %v5247_v9 = vand.u32 4294901760, %v4445_v43 }
  0xa0   :  { %2465 = vmatprep.subr.bf16.mxu0 %v5511_v30  ;;  %v4465_v7 = vsub.f32 %v4431_v31, %v5238_v35 }
  0xa3   :  { %2467 = vmatpush1.bf16.msra.mxu0 %v5512_v37 }
  0xa4   :  { %2469 = vmatprep.subr.bf16.mxu0 %v3392_v63  ;;  %v5517_v63 = vld [vmem:[#allocation7_spill] sm:$0xff] }
  0xa7   :  { %2471 = vmatpush1.bf16.msra.mxu0 %v3398_v5  ;;  %v5518_v5 = vld [vmem:[#allocation50_spill] sm:$0xff] }
  0xa8   :  { %2473 = vmatprep.subr.bf16.mxu0 %v3402_v20  ;;  %v5519_v20 = vld [vmem:[#allocation52_spill] sm:$0xff] }
  0xab   :  { %2475 = vmatpush1.bf16.msra.mxu0 %v3404_v22  ;;  %v5520_v22 = vld [vmem:[#allocation55_spill] sm:$0xff] }
  0xac   :  { %2477 = vmatprep.subr.bf16.mxu0 %v3406_v46  ;;  %v5521_v46 = vld [vmem:[#allocation12_spill] sm:$0xff] }
  0xaf   :  { %2479 = vmatpush1.bf16.msra.mxu0 %v3408_v12  ;;  %v5516_v12 = vld [vmem:[#allocation6_spill] sm:$0xff] }
  0xb0   :  { %2481 = vmatprep.subr.bf16.mxu0 %v5409_v52  ;;  %v4382_v52 = vld [vmem:[%s5008_s3 + $0x188] sm:$0xff] }
  0xb2   :  { %811 = vmatmul.mubr.f32.vlgmr.msra.gmra.mrb[0].mxu0 %v5513_v14 }
  0xb3   :  { %2483 = vmatpush1.bf16.msra.mxu0 %v5413_v47  ;;  %913 = vmatprep.mubr.f32.mxu0 %v5360_v50  ;;  %v5522_v50 = vld [vmem:[#allocation14_spill] sm:$0xff]  ;;  %v5524_v47 = vld [vmem:[#allocation63_spill] sm:$0xff] }
  0xb4   :  { %2485 = vmatprep.subr.bf16.mxu0 %v5417_v26  ;;  %v5525_v26 = vld [vmem:[#allocation20_spill] sm:$0xff] }
  0xb7   :  { %2487 = vmatpush1.bf16.msra.mxu0 %v5424_v59  ;;  %v5243_v59 = vand.u32 4294901760, %v4382_v52 }
  0xb8   :  { %2489 = vmatprep.subr.bf16.mxu0 %v5429_v17  ;;  %v4387_v17 = vld [vmem:[%s5008_s3 + $0x198] sm:$0xff] }
  0xbb   :  { %2491 = vmatpush1.bf16.msra.mxu0 %v5439_v45  ;;  %v4399_v45 = vld [vmem:[%s5008_s3 + $0x190] sm:$0xff] }
  0xbc   :  { %2493 = vmatprep.subr.bf16.mxu0 %v5443_v21  ;;  %v5242_v21 = vand.u32 4294901760, %v4387_v17 }
  0xbf   :  { %2495 = vmatpush1.bf16.msra.mxu0 %v5451_v4  ;;  %v5523_v4 = vld [vmem:[#allocation58_spill] sm:$0xff] }
  0xc0   :  { %2497 = vmatprep.subr.bf16.mxu0 %v5453_v48  ;;  %v5239_v48 = vand.u32 4294901760, %v4399_v45 }
  0xc3   :  { %2499 = vmatpush1.bf16.msra.mxu0 %v5462_v18  ;;  %v4406_v18 = vsub.f32 %v4382_v52, %v5243_v59 }
  0xc4   :  { %2501 = vmatprep.subr.bf16.mxu0 %v5466_v42 }
  0xc5   :  { %v5235_v10 = vand.u32 4294901760, %v4406_v18 }
  0xc7   :  { %2503 = vmatpush1.bf16.msra.mxu0 %v5473_v32  ;;  %v1435_v30 = vsub.f32 %v4406_v18, %v5235_v10 }
  0xc8   :  { %2505 = vmatprep.subr.bf16.mxu0 %v5477_v29  ;;  %v4394_v29 = vld [vmem:[%s5008_s3 + $0x180] sm:$0xff] }
  0xc9   :  { %v5240_v42 = vand.u32 4294901760, %v4394_v29  ;;  %v1436_v35 = vand.u32 4294901760, %v1435_v30 }
  0xcb   :  { %2507 = vmatpush1.bf16.msra.mxu0 %v5487_v34  ;;  %v4411_v34 = vsub.f32 %v4387_v17, %v5242_v21  ;;  %v4416_v32 = vsub.f32 %v4394_v29, %v5240_v42 }
  0xcc   :  { %2509 = vmatprep.subr.bf16.mxu0 %v5490_v53  ;;  %v4421_v53 = vsub.f32 %v4399_v45, %v5239_v48 }
  0xcd   :  { %v5236_v19 = vand.u32 4294901760, %v4411_v34  ;;  %v5241_v62 = vand.u32 4294901760, %v4416_v32 }
  0xce   :  { %v5244_v8 = vand.u32 4294901760, %v4421_v53 }
  0xcf   :  { %2511 = vmatpush1.bf16.msra.mxu0 %v5498_v27  ;;  %v4426_v27 = vld [vmem:[%s5008_s3 + $0x1a8] sm:$0xff]  ;;  %v1447_v37 = vsub.f32 %v4411_v34, %v5236_v19  ;;  %v1441_v0 = vsub.f32 %v4416_v32, %v5241_v62  ;;  %v4476_v19 = vsub.f32 %v4440_v58, %v5246_v11  ;;  %v5248_v62 = vand.u32 4294901760, %v4465_v7 }
  0xd0   :  { %2513 = vmatprep.subr.bf16.mxu0 %v3592_v55  ;;  %v5237_v13 = vand.u32 4294901760, %v4426_v27  ;;  %v1453_v10 = vsub.f32 %v4421_v53, %v5244_v8 }
  0xd1   :  { %v1448_v48 = vand.u32 4294901760, %v1447_v37  ;;  %v1442_v21 = vand.u32 4294901760, %v1441_v0  ;;  %v4496_v37 = vld [vmem:[%s5008_s3 + $0x1c8] sm:$0xff]  ;;  %v4501_v0 = vld [vmem:[%s5008_s3 + $0x1d8] sm:$0xff] }
  0xd2   :  { %915 = vmatmul.mubr.f32.vlgmr.msra.gmra.mrb[0].mxu0 %v5513_v14  ;;  %v4460_v14 = vsub.f32 %v4426_v27, %v5237_v13  ;;  %v4481_v13 = vsub.f32 %v4445_v43, %v5247_v9  ;;  %v1454_v59 = vand.u32 4294901760, %v1453_v10  ;;  %v1471_v9 = vsub.f32 %v4465_v7, %v5248_v62  ;;  %v5526_v10 = vld [vmem:[#allocation60_spill] sm:$0xff]  ;;  %v5528_v62 = vld [vmem:[#allocation61_spill] sm:$0xff] }
  0xd3   :  { %2515 = vmatpush1.bf16.msra.mxu0 %v3621_v28  ;;  %v2624_v61 = vpack.c.bf16 %v1448_v48, %v1436_v35  ;;  %v4506_v48 = vld [vmem:[%s5008_s3 + $0x1c0] sm:$0xff]  ;;  %v5527_v35 = vand.u32 4294901760, %v5526_v10 }
  0xd4   :  { %2517 = vmatprep.subr.bf16.mxu0 %v3656_v39  ;;  %v5249_v42 = vand.u32 4294901760, %v4460_v14  ;;  %v2626_v8 = vpack.c.bf16 %v1454_v59, %v1442_v21  ;;  %v1472_v10 = vand.u32 4294901760, %v1471_v9  ;;  %v4545_v9 = vld [vmem:[%s5008_s3 + $0x1f8] sm:$0xff] }
  0xd5   :  { %2625 = vmatprep.subr.bf16.mxu1 %v2624_v61  ;;  %v5257_v61 = vand.u32 4294901760, %v4501_v0 }
  0xd6   :  { %v1459_v11 = vsub.f32 %v4460_v14, %v5249_v42  ;;  %v5529_v42 = vand.u32 4294901760, %v5528_v62  ;;  %v5532_v62 = vand.u32 4294901760, %v4181_v36  ;;  %2627 = vmatpush1.bf16.msra.mxu1 %v2626_v8  ;;  %v5539_v36 = vand.u32 4294901760, %v4244_v44 }
  0xd7   :  { %2519 = vmatpush1.bf16.msra.mxu0 %v3716_v51  ;;  %v4568_v8 = vsub.f32 %v4501_v0, %v5257_v61  ;;  %v5543_v44 = vand.u32 4294901760, %v4387_v17 }
  0xd8   :  { %2521 = vmatprep.subr.bf16.mxu0 %v3741_v60  ;;  %v4512_v30 = vpack.c.bf16 %v5529_v42, %v5527_v35  ;;  %v5533_v42 = vand.u32 4294901760, %v4196_v23  ;;  %v1460_v21 = vand.u32 4294901760, %v1459_v11 }
  0xd9   :  { %v5264_v17 = vand.u32 4294901760, %v4568_v8 }
  0xda   :  { %5530 = vst [vmem:[#allocation26_spill] sm:$0xff] %v4512_v30  ;;  %v4531_v59 = vpack.c.bf16 %v5533_v42, %v5532_v62  ;;  %v2628_v23 = vpack.c.bf16 %v1472_v10, %v1460_v21  ;;  %v5537_v42 = vand.u32 4294901760, %v4223_v40  ;;  %v5540_v21 = vand.u32 4294901760, %v4262_v16 }
  0xdb   :  { %2523 = vmatpush1.bf16.msra.mxu0 %v5514_v56  ;;  %v5542_v40 = vand.u32 4294901760, %v4382_v52  ;;  %v5545_v16 = vand.u32 4294901760, %v4506_v48 }
  0xdc   :  { %2525 = vmatprep.subr.bf16.mxu0 %v5515_v54  ;;  %5534 = vst [vmem:[#allocation27_spill] sm:$0xff] %v4531_v59  ;;  %v4558_v10 = vpack.c.bf16 %v5540_v21, %v5539_v36  ;;  %2629 = vmatprep.subr.bf16.mxu1 %v2628_v23  ;;  %v5546_v23 = vand.u32 4294901760, %v4394_v29 }
  0xdd   :  { %v4579_v36 = vsub.f32 %v4506_v48, %v5545_v16 }
  0xde   :  { %5541 = vst [vmem:[#allocation43_spill] sm:$0xff] %v4558_v10 }
  0xdf   :  { %2527 = vmatpush1.bf16.msra.mxu0 %v5516_v12  ;;  %v5269_v16 = vand.u32 4294901760, %v4579_v36 }
  0xe0   :  { %2529 = vmatprep.subr.bf16.mxu0 %v5517_v63 }
  0xe3   :  { %2531 = vmatpush1.bf16.msra.mxu0 %v5518_v5 }
  0xe4   :  { %2533 = vmatprep.subr.bf16.mxu0 %v5519_v20 }
  0xe7   :  { %2535 = vmatpush1.bf16.msra.mxu0 %v5520_v22 }
  0xe8   :  { %2537 = vmatprep.subr.bf16.mxu0 %v5521_v46 }
  0xeb   :  { %2539 = vmatpush1.bf16.msra.mxu0 %v5522_v50 }
  0xec   :  { %2541 = vmatprep.subr.bf16.mxu0 %v5523_v4  ;;  %v5258_v4 = vand.u32 4294901760, %v4496_v37 }
  0xef   :  { %2543 = vmatpush1.bf16.msra.mxu0 %v5524_v47 }
  0xf0   :  { %2545 = vmatprep.subr.bf16.mxu0 %v5525_v26  ;;  %v4525_v26 = vld [vmem:[%s5008_s3 + $0x1e8] sm:$0xff] }
  0xf1   :  { %v5549_v61 = vand.u32 4294901760, %v4525_v26 }
  0xf3   :  { %2547 = vmatpush1.bf16.msra.mxu0 %v4231_v57  ;;  %v4520_v57 = vld [vmem:[%s5008_s3 + $0x1d0] sm:$0xff]  ;;  %v4608_v29 = vsub.f32 %v4525_v26, %v5549_v61 }
  0xf4   :  { %2549 = vmatprep.subr.bf16.mxu0 %v4257_v15  ;;  %v5256_v11 = vand.u32 4294901760, %v4520_v57 }
  0xf7   :  { %2551 = vmatpush1.bf16.msra.mxu0 %v4311_v3  ;;  %v5531_v3 = vand.u32 4294901760, %v4476_v19 }
  0xf8   :  { %2553 = vmatprep.subr.bf16.mxu0 %v4512_v30 }
  0xf9   :  { %v1465_v15 = vsub.f32 %v4476_v19, %v5531_v3  ;;  %v5535_v3 = vand.u32 4294901760, %v4481_v13 }
  0xfb   :  { %v1477_v35 = vsub.f32 %v4481_v13, %v5535_v3  ;;  %v1466_v47 = vand.u32 4294901760, %v1465_v15  ;;  %2555 = vmatpush1.bf16.msra.mxu0 %v4531_v59  ;;  %v5536_v15 = vand.u32 4294901760, %v4218_v24 }
  0xfd   :  { %v1478_v62 = vand.u32 4294901760, %v1477_v35  ;;  %v4552_v3 = vpack.c.bf16 %v5537_v42, %v5536_v15  ;;  %v4563_v35 = vsub.f32 %v4496_v37, %v5258_v4  ;;  %v4574_v15 = vpack.c.bf16 %v5543_v44, %v5542_v40  ;;  %v985_v44 = vld [vmem:[%s5008_s3 + $0x1f0] sm:$0xff] }
  0xfe   :  { %v4584_v42 = vsub.f32 %v4520_v57, %v5256_v11  ;;  %v1123_v40 = vand.u32 4294901760, %v4545_v9  ;;  %v1495_v4 = vsub.f32 %v4568_v8, %v5264_v17 }
  0xff   :  { %5538 = vst [vmem:[#allocation18_spill] sm:$0xff] %v4552_v3  ;;  %v2630_v24 = vpack.c.bf16 %v1478_v62, %v1466_v47  ;;  %5544 = vst [vmem:[#allocation46_spill] sm:$0xff] %v4574_v15  ;;  %v983_v47 = vld [vmem:[%s5008_s3 + $0x1e0] sm:$0xff]  ;;  %2557 = vmatprep.subr.bf16.mxu0 %v4552_v3  ;;  %v5259_v52 = vand.u32 4294901760, %v4563_v35  ;;  %v5547_v62 = vand.u32 4294901760, %v4399_v45  ;;  %v5550_v45 = vand.u32 4294901760, %v4426_v27 }
 0x100   :  { %2559 = vmatpush1.bf16.msra.mxu0 %v4558_v10  ;;  %v4624_v11 = vsub.f32 %v4545_v9, %v1123_v40  ;;  %v1121_v61 = vand.u32 4294901760, %v983_v47  ;;  %v1489_v27 = vsub.f32 %v4579_v36, %v5269_v16  ;;  %v1496_v3 = vand.u32 4294901760, %v1495_v4 }
 0x101   :  { %v4596_v21 = vpack.c.bf16 %v5547_v62, %v5546_v23  ;;  %2631 = vmatpush1.bf16.msra.mxu1 %v2630_v24  ;;  %v5551_v23 = vand.u32 4294901760, %v4431_v31  ;;  %v1483_v24 = vsub.f32 %v4563_v35, %v5259_v52  ;;  %2561 = vmatprep.subr.bf16.mxu0 %v4574_v15  ;;  %v5553_v31 = vand.u32 4294901760, %v4584_v42 }
 0x102   :  { %v1125_v52 = vand.u32 4294901760, %v985_v44  ;;  %v5274_v17 = vand.u32 4294901760, %v4624_v11  ;;  %v4634_v15 = vsub.f32 %v983_v47, %v1121_v61  ;;  %v1490_v9 = vand.u32 4294901760, %v1489_v27 }
 0x103   :  { %5548 = vst [vmem:[#allocation6_spill] sm:$0xff] %v4596_v21  ;;  %v4614_v62 = vpack.c.bf16 %v5551_v23, %v5550_v45  ;;  %v1501_v45 = vsub.f32 %v4584_v42, %v5553_v31  ;;  %v5278_v23 = vand.u32 4294901760, %v4608_v29  ;;  %v1484_v10 = vand.u32 4294901760, %v1483_v24 }
 0x104   :  { %2563 = vmatpush1.bf16.msra.mxu0 %v4596_v21  ;;  %v4640_v30 = vsub.f32 %v985_v44, %v1125_v52  ;;  %v1519_v24 = vsub.f32 %v4624_v11, %v5274_v17  ;;  %v5276_v4 = vand.u32 4294901760, %v4634_v15  ;;  %v5554_v47 = vand.u32 4294901760, %v4440_v58 }
 0x105   :  { %5552 = vst [vmem:[#allocation60_spill] sm:$0xff] %v4614_v62  ;;  %v1502_v59 = vand.u32 4294901760, %v1501_v45  ;;  %v1507_v16 = vsub.f32 %v4608_v29, %v5278_v23  ;;  %v2632_v31 = vpack.c.bf16 %v1496_v3, %v1484_v10  ;;  %2565 = vmatprep.subr.bf16.mxu0 %v4614_v62  ;;  %v5555_v27 = vand.u32 4294901760, %v4445_v43  ;;  %v5573_v23 = vld [vmem:[#allocation29_spill] sm:$0xff] }
 0x106   :  { %v5275_v44 = vand.u32 4294901760, %v4640_v30  ;;  %v1520_v3 = vand.u32 4294901760, %v1519_v24  ;;  %v1513_v10 = vsub.f32 %v4634_v15, %v5276_v4  ;;  %v5560_v24 = vld [vmem:[#allocation19_spill] sm:$0xff] }
 0x107   :  { %v4651_v45 = vpack.c.bf16 %v5555_v27, %v5554_v47  ;;  %v2634_v21 = vpack.c.bf16 %v1502_v59, %v1490_v9  ;;  %v1508_v50 = vand.u32 4294901760, %v1507_v16  ;;  %2633 = vmatprep.subr.bf16.mxu1 %v2632_v31  ;;  %v5557_v59 = vand.u32 4294901760, %v4496_v37  ;;  %v5561_v47 = vld [vmem:[#allocation21_spill] sm:$0xff] }
 0x108   :  { %v1525_v17 = vsub.f32 %v4640_v30, %v5275_v44  ;;  %v1514_v43 = vand.u32 4294901760, %v1513_v10  ;;  %v5558_v16 = vand.u32 4294901760, %v4501_v0  ;;  %v2640_v27 = vpack.c.bf16 %v5561_v47, %v5560_v24 }
 0x109   :  { %5556 = vst [vmem:[#allocation61_spill] sm:$0xff] %v4651_v45  ;;  %2635 = vmatpush1.bf16.msra.mxu1 %v2634_v21  ;;  %2567 = vmatpush1.bf16.msra.mxu0 %v4651_v45  ;;  %v2636_v58 = vpack.c.bf16 %v1520_v3, %v1508_v50  ;;  %v5562_v21 = vand.u32 4294901760, %v4506_v48  ;;  %v5563_v44 = vand.u32 4294901760, %v4520_v57  ;;  %v5565_v37 = vand.u32 4294901760, %v4525_v26  ;;  %v54_v26 = vld [vmem:[%s5007_s2] sm:$0x3] }
 0x10a   :  { %v4665_v9 = vpack.c.bf16 %v5558_v16, %v5557_v59  ;;  %v1526_v31 = vand.u32 4294901760, %v1525_v17  ;;  %v4682_v17 = vpack.c.bf16 %v1125_v52, %v1121_v61  ;;  %v5277_v48 = vlaneseq }
 0x10b   :  { %2637 = vmatprep.subr.bf16.mxu1 %v2636_v58  ;;  %v4674_v4 = vpack.c.bf16 %v5563_v44, %v5562_v21  ;;  %v4679_v0 = vpack.c.bf16 %v1123_v40, %v5565_v37  ;;  %v5572_v37 = vld [vmem:[#allocation28_spill] sm:$0xff] }
 0x10c   :  { %5559 = vst [vmem:[#allocation65_spill] sm:$0xff] %v4665_v9  ;;  %2569 = vmatprep.subr.bf16.mxu0 %v4665_v9  ;;  %v2638_v50 = vpack.c.bf16 %v1526_v31, %v1514_v43  ;;  %5567 = vst [vmem:[#allocation67_spill] sm:$0xff] %v4682_v17  ;;  %v4688_v44 = vshrl.u32 %v5277_v48, 7 }
 0x10d   :  { %5564 = vst [vmem:[#allocation19_spill] sm:$0xff] %v4674_v4  ;;  %2571 = vmatpush1.bf16.msra.mxu0 %v4674_v4  ;;  %5566 = vst [vmem:[#allocation66_spill] sm:$0xff] %v4679_v0 }
 0x10e   :  { %2639 = vmatpush1.bf16.msra.mxu1 %v2638_v50  ;;  %2573 = vmatprep.subr.bf16.mxu0 %v4679_v0  ;;  %5568 = vst [vmem:[#allocation68_spill] sm:$0xff] %v4688_v44  ;;  %v5279_v3 = vsub.s32 0, %v4688_v44  ;;  %v5280_v40 = vsub.s32 1, %v4688_v44  ;;  %v5571_v50 = vld [vmem:[#allocation22_spill] sm:$0xff] }
 0x10f   :  { %2641 = vmatprep.subr.bf16.mxu1 %v2640_v27  ;;  %v2642_v48 = vpack.c.bf16 %v5572_v37, %v5571_v50  ;;  %v5585_v50 = vld [vmem:[#allocation41_spill] sm:$0xff] }
 0x110   :  { %v59_v52 = vrot.slane %v54_v26, %v5279_v3  ;;  %v63_v61 = vrot.slane %v54_v26, %v5280_v40  ;;  %v5574_v3 = vld [vmem:[#allocation30_spill] sm:$0xff] }
 0x111   :  { %2575 = vmatpush1.bf16.msra.mxu0 %v4682_v17  ;;  %v2644_v57 = vpack.c.bf16 %v5574_v3, %v5573_v23  ;;  %v5578_v40 = vld [vmem:[#allocation34_spill] sm:$0xff]  ;;  %v5580_v3 = vld [vmem:[#allocation36_spill] sm:$0xff] }
 0x112   :  { %v5586_v17 = vld [vmem:[#allocation42_spill] sm:$0xff] }
 0x1a5   :  { %v916_v10 = vpop.f32.mrb[0].mxu0 }
 0x1a6   :  { %v2896_v58 = vadd.f32 %v916_v10, %v59_v52  ;;  %v918_v43 = vpop.f32.mrb[1].mxu0  ;;  %v5575_v10 = vld [vmem:[#allocation31_spill] sm:$0xff] }
 0x1a7   :  { %v2897_v59 = vadd.f32 %v918_v43, %v63_v61 }
 0x1a8   :  { %2923 = vtanh.f32 %v2896_v58  ;;  %v5576_v58 = vld [vmem:[#allocation32_spill] sm:$0xff] }
 0x1a9   :  { %2925 = vtanh.f32 %v2897_v59  ;;  %v2646_v43 = vpack.c.bf16 %v5576_v58, %v5575_v10  ;;  %v5581_v10 = vld [vmem:[#allocation37_spill] sm:$0xff] }
 0x1b2   :  { %v2924_v16 = vpop.eup %2923 }
 0x1b3   :  { %v2926_v31 = vpop.eup %2925  ;;  %v4699_v27 = vand.u32 4294901760, %v2924_v16 }
 0x1b4   :  { %v4701_v21 = vand.u32 4294901760, %v2926_v31 }
 0x1b5   :  { %5569 = vst [vmem:[#allocation69_spill] sm:$0xff] %v4699_v27  ;;  %v4708_v26 = vsub.f32 %v2924_v16, %v4699_v27  ;;  %v5577_v16 = vld [vmem:[#allocation33_spill] sm:$0xff] }
 0x1b6   :  { %5570 = vst [vmem:[#allocation70_spill] sm:$0xff] %v4701_v21  ;;  %1529 = vmatprep.mubr.f32.mxu1 %v4701_v21  ;;  %v4712_v52 = vsub.f32 %v2926_v31, %v4701_v21  ;;  %v2648_v44 = vpack.c.bf16 %v5578_v40, %v5577_v16  ;;  %v5579_v21 = vld [vmem:[#allocation35_spill] sm:$0xff]  ;;  %v5584_v16 = vld [vmem:[#allocation40_spill] sm:$0xff] }
 0x1b7   :  { %1531 = vmatmul.mubr.f32.vlgmr.msra.gmra.mrb[0].mxu1 %v4699_v27  ;;  %v5287_v61 = vand.u32 4294901760, %v4708_v26  ;;  %v2650_v23 = vpack.c.bf16 %v5580_v3, %v5579_v21  ;;  %v5583_v40 = vld [vmem:[#allocation39_spill] sm:$0xff] }
 0x1b8   :  { %2643 = vmatpush1.bf16.msra.mxu1 %v2642_v48  ;;  %1731 = vmatprep.mubr.f32.mxu1 %v4712_v52  ;;  %v5290_v59 = vand.u32 4294901760, %v4712_v52 }
 0x1b9   :  { %2645 = vmatprep.subr.bf16.mxu1 %v2644_v57  ;;  %v1136_v31 = vsub.f32 %v4708_v26, %v5287_v61  ;;  %v5582_v57 = vld [vmem:[#allocation38_spill] sm:$0xff]  ;;  %v2654_v61 = vpack.c.bf16 %v5584_v16, %v5583_v40  ;;  %v5596_v40 = vld [vmem:[#allocation51_spill] sm:$0xff] }
 0x1ba   :  { %v1130_v27 = vsub.f32 %v4712_v52, %v5290_v59  ;;  %v2652_v37 = vpack.c.bf16 %v5582_v57, %v5581_v10  ;;  %v2656_v59 = vpack.c.bf16 %v5586_v17, %v5585_v50  ;;  %v5591_v57 = vld [vmem:[#allocation5_spill] sm:$0xff]  ;;  %v5594_v10 = vld [vmem:[#allocation8_spill] sm:$0xff]  ;;  %v5598_v50 = vld [vmem:[#allocation10_spill] sm:$0xff] }
 0x1bb   :  { %v1137_v58 = vand.u32 4294901760, %v1136_v31  ;;  %v5590_v31 = vld [vmem:[#allocation48_spill] sm:$0xff] }
 0x1bc   :  { %2647 = vmatpush1.bf16.msra.mxu1 %v2646_v43  ;;  %v1131_v48 = vand.u32 4294901760, %v1130_v27  ;;  %v5587_v27 = vld [vmem:[#allocation44_spill] sm:$0xff]  ;;  %v5588_v43 = vld [vmem:[#allocation45_spill] sm:$0xff] }
 0x1bd   :  { %2649 = vmatprep.subr.bf16.mxu1 %v2648_v44  ;;  %v2658_v47 = vpack.c.bf16 %v5588_v43, %v5587_v27  ;;  %v5589_v44 = vld [vmem:[#allocation47_spill] sm:$0xff]  ;;  %v5600_v27 = vld [vmem:[#allocation54_spill] sm:$0xff] }
 0x1be   :  { %1132 = vmatprep.mubr.f32.mxu0 %v1131_v48  ;;  %v2660_v3 = vpack.c.bf16 %v5590_v31, %v5589_v44  ;;  %v5592_v48 = vld [vmem:[#allocation23_spill] sm:$0xff]  ;;  %v5602_v44 = vld [vmem:[#allocation56_spill] sm:$0xff] }
 0x1bf   :  { %1138 = vmatmul.mubr.f32.vlgmr.msra.gmra.mrb[2].mxu0 %v1137_v58  ;;  %v2662_v58 = vpack.c.bf16 %v5592_v48, %v5591_v57  ;;  %v5604_v57 = vld [vmem:[#allocation57_spill] sm:$0xff] }
 0x1c0   :  { %2651 = vmatpush1.bf16.msra.mxu1 %v2650_v23  ;;  %v5593_v23 = vld [vmem:[#allocation49_spill] sm:$0xff] }
 0x1c1   :  { %2653 = vmatprep.subr.bf16.mxu1 %v2652_v37  ;;  %v2664_v16 = vpack.c.bf16 %v5594_v10, %v5593_v23  ;;  %v5595_v37 = vld [vmem:[#allocation9_spill] sm:$0xff]  ;;  %v5606_v23 = vld [vmem:[#allocation59_spill] sm:$0xff] }
 0x1c2   :  { %v2666_v17 = vpack.c.bf16 %v5596_v40, %v5595_v37  ;;  %v5608_v37 = vld [vmem:[#allocation62_spill] sm:$0xff] }
 0x1c4   :  { %2655 = vmatpush1.bf16.msra.mxu1 %v2654_v61  ;;  %v5597_v61 = vld [vmem:[#allocation53_spill] sm:$0xff] }
 0x1c5   :  { %2657 = vmatprep.subr.bf16.mxu1 %v2656_v59  ;;  %v2668_v43 = vpack.c.bf16 %v5598_v50, %v5597_v61  ;;  %v5599_v59 = vld [vmem:[#allocation11_spill] sm:$0xff] }
 0x1c6   :  { %v2670_v31 = vpack.c.bf16 %v5600_v27, %v5599_v59 }
 0x1c8   :  { %2659 = vmatpush1.bf16.msra.mxu1 %v2658_v47  ;;  %v5601_v47 = vld [vmem:[#allocation13_spill] sm:$0xff] }
 0x1c9   :  { %2661 = vmatprep.subr.bf16.mxu1 %v2660_v3  ;;  %v2672_v48 = vpack.c.bf16 %v5602_v44, %v5601_v47  ;;  %v5603_v3 = vld [vmem:[#allocation15_spill] sm:$0xff] }
 0x1ca   :  { %v2674_v10 = vpack.c.bf16 %v5604_v57, %v5603_v3 }
 0x1cc   :  { %2663 = vmatpush1.bf16.msra.mxu1 %v2662_v58  ;;  %v5605_v58 = vld [vmem:[#allocation16_spill] sm:$0xff] }
 0x1cd   :  { %2665 = vmatprep.subr.bf16.mxu1 %v2664_v16  ;;  %v2676_v40 = vpack.c.bf16 %v5606_v23, %v5605_v58  ;;  %v5607_v16 = vld [vmem:[#allocation17_spill] sm:$0xff] }
 0x1ce   :  { %v2678_v50 = vpack.c.bf16 %v5608_v37, %v5607_v16 }
 0x1d0   :  { %2667 = vmatpush1.bf16.msra.mxu1 %v2666_v17  ;;  %v2680_v17 = vpack.c.bf16 %v4212_v2, %v4207_v1 }
 0x1d1   :  { %2669 = vmatprep.subr.bf16.mxu1 %v2668_v43  ;;  %v2682_v43 = vpack.c.bf16 %v4249_v6, %v4239_v33 }
 0x1d4   :  { %2671 = vmatpush1.bf16.msra.mxu1 %v2670_v31  ;;  %v2684_v31 = vpack.c.bf16 %v4284_v25, %v4279_v38 }
 0x1d5   :  { %2673 = vmatprep.subr.bf16.mxu1 %v2672_v48  ;;  %v2686_v48 = vpack.c.bf16 %v4305_v41, %v4300_v49 }
 0x1d8   :  { %2675 = vmatpush1.bf16.msra.mxu1 %v2674_v10  ;;  %v2688_v10 = vpack.c.bf16 %v4411_v34, %v4406_v18 }
 0x1d9   :  { %2677 = vmatprep.subr.bf16.mxu1 %v2676_v40  ;;  %v2690_v40 = vpack.c.bf16 %v4421_v53, %v4416_v32 }
 0x1dc   :  { %2679 = vmatpush1.bf16.msra.mxu1 %v2678_v50  ;;  %v2692_v50 = vpack.c.bf16 %v4465_v7, %v4460_v14 }
 0x1dd   :  { %2681 = vmatprep.subr.bf16.mxu1 %v2680_v17  ;;  %v2694_v17 = vpack.c.bf16 %v4481_v13, %v4476_v19 }
 0x1e0   :  { %2683 = vmatpush1.bf16.msra.mxu1 %v2682_v43  ;;  %v2696_v43 = vpack.c.bf16 %v4568_v8, %v4563_v35 }
 0x1e1   :  { %2685 = vmatprep.subr.bf16.mxu1 %v2684_v31  ;;  %v2698_v31 = vpack.c.bf16 %v4584_v42, %v4579_v36 }
 0x1e4   :  { %2687 = vmatpush1.bf16.msra.mxu1 %v2686_v48  ;;  %v2700_v48 = vpack.c.bf16 %v4624_v11, %v4608_v29 }
 0x1e5   :  { %2689 = vmatprep.subr.bf16.mxu1 %v2688_v10  ;;  %v5609_v10 = vpack.c.bf16 %v4640_v30, %v4634_v15 }
 0x1e8   :  { %2691 = vmatpush1.bf16.msra.mxu1 %v2690_v40  ;;  %v5610_v40 = vand.u32 4294901760, %v4712_v52  ;;  %v5611_v52 = vld [vmem:[#allocation14_spill] sm:$0xff] }
 0x1e9   :  { %2693 = vmatprep.subr.bf16.mxu1 %v2692_v50  ;;  %v5612_v50 = vld [vmem:[#allocation58_spill] sm:$0xff] }
 0x1ec   :  { %2695 = vmatpush1.bf16.msra.mxu1 %v2694_v17  ;;  %v5613_v17 = vld [vmem:[#allocation63_spill] sm:$0xff] }
 0x1ed   :  { %2697 = vmatprep.subr.bf16.mxu1 %v2696_v43  ;;  %v5614_v43 = vld [vmem:[#allocation20_spill] sm:$0xff] }
 0x1f0   :  { %2699 = vmatpush1.bf16.msra.mxu1 %v2698_v31  ;;  %v5615_v31 = vld [vmem:[#allocation24_spill] sm:$0xff] }
 0x1f1   :  { %2701 = vmatprep.subr.bf16.mxu1 %v2700_v48  ;;  %v5616_v48 = vld [vmem:[#allocation25_spill] sm:$0xff] }
 0x1f4   :  { %2703 = vmatpush1.bf16.msra.mxu1 %v5609_v10  ;;  %v5617_v10 = vld [vmem:[#allocation64_spill] sm:$0xff] }
 0x1f5   :  { %2705 = vmatprep.subr.bf16.mxu1 %v3592_v55 }
 0x1f7   :  { %1734 = vmatmul.mubr.f32.vlgmr.msra.gmra.mrb[0].mxu1 %v4708_v26 }
 0x1f8   :  { %2707 = vmatpush1.bf16.msra.mxu1 %v3621_v28  ;;  %1871 = vmatprep.mubr.f32.mxu1 %v5610_v40  ;;  %v5618_v40 = vld [vmem:[#allocation26_spill] sm:$0xff] }
 0x1f9   :  { %2709 = vmatprep.subr.bf16.mxu1 %v3656_v39 }
 0x1fc   :  { %2711 = vmatpush1.bf16.msra.mxu1 %v3716_v51 }
 0x1fd   :  { %2713 = vmatprep.subr.bf16.mxu1 %v3741_v60 }
 0x200   :  { %2715 = vmatpush1.bf16.msra.mxu1 %v5514_v56 }
 0x201   :  { %2717 = vmatprep.subr.bf16.mxu1 %v5515_v54 }
 0x204   :  { %2719 = vmatpush1.bf16.msra.mxu1 %v5516_v12 }
 0x205   :  { %2721 = vmatprep.subr.bf16.mxu1 %v5517_v63 }
 0x208   :  { %2723 = vmatpush1.bf16.msra.mxu1 %v5518_v5  ;;  %v5651_v5 = vld [vmem:[#allocation38_spill] sm:$0xff] }
 0x209   :  { %2725 = vmatprep.subr.bf16.mxu1 %v5519_v20  ;;  %v5619_v20 = vld [vmem:[#allocation27_spill] sm:$0xff] }
 0x20c   :  { %2727 = vmatpush1.bf16.msra.mxu1 %v5520_v22  ;;  %v5620_v22 = vld [vmem:[#allocation18_spill] sm:$0xff] }
 0x20d   :  { %2729 = vmatprep.subr.bf16.mxu1 %v5521_v46  ;;  %v5621_v46 = vld [vmem:[#allocation43_spill] sm:$0xff] }
 0x210   :  { %2731 = vmatpush1.bf16.msra.mxu1 %v5611_v52  ;;  %v5622_v52 = vld [vmem:[#allocation46_spill] sm:$0xff] }
 0x211   :  { %2733 = vmatprep.subr.bf16.mxu1 %v5612_v50  ;;  %v5623_v50 = vld [vmem:[#allocation6_spill] sm:$0xff] }
 0x214   :  { %2735 = vmatpush1.bf16.msra.mxu1 %v5613_v17 }
 0x215   :  { %2737 = vmatprep.subr.bf16.mxu1 %v5614_v43 }
 0x218   :  { %2739 = vmatpush1.bf16.msra.mxu1 %v5615_v31 }
 0x219   :  { %2741 = vmatprep.subr.bf16.mxu1 %v5616_v48 }
 0x21c   :  { %2743 = vmatpush1.bf16.msra.mxu1 %v5617_v10 }
 0x21d   :  { %2745 = vmatprep.subr.bf16.mxu1 %v5618_v40  ;;  %v5625_v40 = vld [vmem:[#allocation21_spill] sm:$0xff] }
 0x220   :  { %2747 = vmatpush1.bf16.msra.mxu1 %v5619_v20  ;;  %v5624_v20 = vand.u32 4294901760, %v5560_v24  ;;  %v5637_v24 = vld [vmem:[#allocation70_spill] sm:$0xff] }
 0x221   :  { %2749 = vmatprep.subr.bf16.mxu1 %v5620_v22  ;;  %v5626_v22 = vand.u32 4294901760, %v5625_v40  ;;  %v5640_v40 = vld [vmem:[#allocation32_spill] sm:$0xff] }
 0x223   :  { %v2768_v10 = vpack.c.bf16 %v5626_v22, %v5624_v20  ;;  %v5638_v20 = vld [vmem:[#allocation31_spill] sm:$0xff] }
 0x224   :  { %2751 = vmatpush1.bf16.msra.mxu1 %v5621_v46  ;;  %v5627_v46 = vld [vmem:[#allocation67_spill] sm:$0xff]  ;;  %v5639_v22 = vand.u32 4294901760, %v5638_v20  ;;  %v5652_v20 = vand.u32 4294901760, %v5651_v5 }
 0x225   :  { %2753 = vmatprep.subr.bf16.mxu1 %v5622_v52  ;;  %v5628_v52 = vld [vmem:[#allocation22_spill] sm:$0xff]  ;;  %v5665_v5 = vld [vmem:[#allocation47_spill] sm:$0xff] }
 0x226   :  { %v5629_v48 = vand.u32 4294901760, %v5628_v52 }
 0x228   :  { %2755 = vmatpush1.bf16.msra.mxu1 %v5623_v50  ;;  %v5630_v50 = vld [vmem:[#allocation28_spill] sm:$0xff] }
 0x229   :  { %2757 = vmatprep.subr.bf16.mxu1 %v4614_v62  ;;  %v5631_v31 = vand.u32 4294901760, %v5630_v50  ;;  %v5642_v50 = vld [vmem:[#allocation33_spill] sm:$0xff] }
 0x22b   :  { %v2770_v62 = vpack.c.bf16 %v5631_v31, %v5629_v48  ;;  %v5643_v31 = vand.u32 4294901760, %v5642_v50  ;;  %v5644_v48 = vld [vmem:[#allocation34_spill] sm:$0xff] }
 0x22c   :  { %2759 = vmatpush1.bf16.msra.mxu1 %v4651_v45  ;;  %v5632_v45 = vld [vmem:[#allocation29_spill] sm:$0xff] }
 0x22d   :  { %2761 = vmatprep.subr.bf16.mxu1 %v4665_v9  ;;  %v5633_v43 = vand.u32 4294901760, %v5632_v45  ;;  %v5634_v9 = vld [vmem:[#allocation30_spill] sm:$0xff] }
 0x22e   :  { %v5635_v17 = vand.u32 4294901760, %v5634_v9  ;;  %v5646_v9 = vand.u32 4294901760, %v5579_v21 }
 0x230   :  { %2763 = vmatpush1.bf16.msra.mxu1 %v4674_v4  ;;  %v2772_v4 = vpack.c.bf16 %v5635_v17, %v5633_v43  ;;  %v5647_v17 = vld [vmem:[#allocation36_spill] sm:$0xff] }
 0x231   :  { %2765 = vmatprep.subr.bf16.mxu1 %v4679_v0  ;;  %v5636_v0 = vand.u32 4294901760, %v4708_v26  ;;  %v5648_v26 = vand.u32 4294901760, %v5647_v17  ;;  %v5663_v17 = vld [vmem:[#allocation45_spill] sm:$0xff] }
 0x234   :  { %2767 = vmatpush1.bf16.msra.mxu1 %v5627_v46  ;;  %v5641_v46 = vand.u32 4294901760, %v5640_v40 }
 0x235   :  { %2769 = vmatprep.subr.bf16.mxu1 %v2768_v10  ;;  %v5645_v10 = vand.u32 4294901760, %v5644_v48  ;;  %v5659_v48 = vld [vmem:[#allocation42_spill] sm:$0xff] }
 0x236   :  { %v2774_v52 = vpack.c.bf16 %v5641_v46, %v5639_v22  ;;  %v5653_v46 = vld [vmem:[#allocation39_spill] sm:$0xff]  ;;  %v5655_v22 = vld [vmem:[#allocation40_spill] sm:$0xff]  ;;  %v5660_v21 = vand.u32 4294901760, %v5659_v48 }
 0x237   :  { %1875 = vmatmul.mubr.f32.vlgmr.msra.gmra.mrb[0].mxu1 %v5636_v0  ;;  %v2776_v45 = vpack.c.bf16 %v5645_v10, %v5643_v31  ;;  %v2778_v0 = vpack.c.bf16 %v5648_v26, %v5646_v9  ;;  %v5656_v40 = vand.u32 4294901760, %v5655_v22  ;;  %v5657_v31 = vld [vmem:[#allocation41_spill] sm:$0xff]  ;;  %v5661_v9 = vld [vmem:[#allocation44_spill] sm:$0xff]  ;;  %v5664_v26 = vand.u32 4294901760, %v5663_v17  ;;  %v5671_v22 = vld [vmem:[#allocation23_spill] sm:$0xff] }
 0x238   :  { %2771 = vmatpush1.bf16.msra.mxu1 %v2770_v62  ;;  %2138 = vmatprep.mubr.f32.mxu1 %v5637_v24  ;;  %v5649_v62 = vld [vmem:[#allocation37_spill] sm:$0xff]  ;;  %v5675_v48 = vld [vmem:[#allocation8_spill] sm:$0xff]  ;;  %v5679_v17 = vld [vmem:[#allocation51_spill] sm:$0xff] }
 0x239   :  { %2773 = vmatprep.subr.bf16.mxu1 %v2772_v4  ;;  %v5650_v43 = vand.u32 4294901760, %v5649_v62  ;;  %v5654_v4 = vand.u32 4294901760, %v5653_v46 }
 0x23b   :  { %v2780_v63 = vpack.c.bf16 %v5652_v20, %v5650_v43  ;;  %v2782_v50 = vpack.c.bf16 %v5656_v40, %v5654_v4  ;;  %v5667_v43 = vld [vmem:[#allocation48_spill] sm:$0xff]  ;;  %v5669_v4 = vld [vmem:[#allocation5_spill] sm:$0xff]  ;;  %v5672_v40 = vand.u32 4294901760, %v5671_v22  ;;  %v5686_v22 = vand.u32 4294901760, %v5601_v47 }
 0x23c   :  { %2775 = vmatpush1.bf16.msra.mxu1 %v2774_v52  ;;  %v5658_v52 = vand.u32 4294901760, %v5657_v31  ;;  %v5668_v20 = vand.u32 4294901760, %v5667_v43  ;;  %v5693_v47 = vand.u32 4294901760, %v5608_v37  ;;  %v5700_v37 = vand.u32 4294901760, %v4300_v49 }
 0x23d   :  { %2777 = vmatprep.subr.bf16.mxu1 %v2776_v45  ;;  %v5662_v45 = vand.u32 4294901760, %v5661_v9  ;;  %v5707_v49 = vand.u32 4294901760, %v4465_v7  ;;  %v5714_v7 = vand.u32 4294901760, %v4608_v29  ;;  %v5730_v29 = vld [vmem:[#allocation64_spill] sm:$0xff] }
 0x23e   :  { %v2784_v10 = vpack.c.bf16 %v5660_v21, %v5658_v52  ;;  %v5673_v52 = vld [vmem:[#allocation49_spill] sm:$0xff]  ;;  %v5676_v21 = vand.u32 4294901760, %v5675_v48  ;;  %v5690_v48 = vand.u32 4294901760, %v5605_v58  ;;  %v5697_v58 = vand.u32 4294901760, %v4249_v6 }
 0x23f   :  { %v2786_v62 = vpack.c.bf16 %v5664_v26, %v5662_v45  ;;  %v5677_v45 = vld [vmem:[#allocation9_spill] sm:$0xff]  ;;  %v5680_v26 = vand.u32 4294901760, %v5679_v17  ;;  %v5704_v6 = vand.u32 4294901760, %v4416_v32  ;;  %v5711_v32 = vand.u32 4294901760, %v4568_v8 }
 0x240   :  { %2779 = vmatpush1.bf16.msra.mxu1 %v2778_v0  ;;  %v5666_v0 = vand.u32 4294901760, %v5665_v5  ;;  %v5718_v8 = vld [vmem:[#allocation69_spill] sm:$0xff] }
 0x241   :  { %2781 = vmatprep.subr.bf16.mxu1 %v2780_v63  ;;  %v5670_v63 = vand.u32 4294901760, %v5669_v4  ;;  %v5685_v4 = vand.u32 4294901760, %v5600_v27  ;;  %v5692_v27 = vand.u32 4294901760, %v5607_v16  ;;  %v5699_v16 = vand.u32 4294901760, %v4284_v25 }
 0x242   :  { %v2788_v46 = vpack.c.bf16 %v5668_v20, %v5666_v0  ;;  %v5682_v0 = vld [vmem:[#allocation10_spill] sm:$0xff]  ;;  %v5706_v25 = vand.u32 4294901760, %v4460_v14  ;;  %v5713_v14 = vand.u32 4294901760, %v4584_v42  ;;  %v5729_v42 = vld [vmem:[#allocation25_spill] sm:$0xff] }
 0x243   :  { %v2790_v31 = vpack.c.bf16 %v5672_v40, %v5670_v63  ;;  %v5683_v43 = vand.u32 4294901760, %v5682_v0  ;;  %v5687_v40 = vand.u32 4294901760, %v5602_v44  ;;  %v5694_v44 = vand.u32 4294901760, %v4207_v1 }
 0x244   :  { %2783 = vmatpush1.bf16.msra.mxu1 %v2782_v50  ;;  %v5674_v50 = vand.u32 4294901760, %v5673_v52  ;;  %v5688_v52 = vand.u32 4294901760, %v5603_v3  ;;  %v5695_v3 = vand.u32 4294901760, %v4212_v2  ;;  %v5701_v1 = vand.u32 4294901760, %v4305_v41 }
 0x245   :  { %2785 = vmatprep.subr.bf16.mxu1 %v2784_v10  ;;  %v5678_v10 = vand.u32 4294901760, %v5677_v45  ;;  %v5702_v2 = vand.u32 4294901760, %v4406_v18  ;;  %v2820_v0 = vpack.c.bf16 %v5707_v49, %v5706_v25  ;;  %v5708_v41 = vand.u32 4294901760, %v4476_v19 }
 0x246   :  { %v2792_v9 = vpack.c.bf16 %v5676_v21, %v5674_v50  ;;  %v2808_v45 = vpack.c.bf16 %v5695_v3, %v5694_v44  ;;  %v5709_v18 = vand.u32 4294901760, %v4481_v13  ;;  %v5715_v19 = vand.u32 4294901760, %v4624_v11  ;;  %v5721_v11 = vld [vmem:[#allocation52_spill] sm:$0xff] }
 0x247   :  { %v2794_v5 = vpack.c.bf16 %v5680_v26, %v5678_v10  ;;  %v2814_v26 = vpack.c.bf16 %v5701_v1, %v5700_v37  ;;  %v5716_v13 = vand.u32 4294901760, %v4634_v15  ;;  %v5723_v15 = vld [vmem:[#allocation12_spill] sm:$0xff]  ;;  %v2952_v44 = vmov 1966171168  }
 0x248   :  { %2787 = vmatpush1.bf16.msra.mxu1 %v2786_v62  ;;  %v5681_v62 = vand.u32 4294901760, %v5597_v61  ;;  %v5689_v61 = vand.u32 4294901760, %v5604_v57  ;;  %v5696_v57 = vand.u32 4294901760, %v4239_v33  ;;  %v5703_v33 = vand.u32 4294901760, %v4411_v34 }
 0x249   :  { %2789 = vmatprep.subr.bf16.mxu1 %v2788_v46  ;;  %v5684_v46 = vand.u32 4294901760, %v5599_v59  ;;  %v5691_v59 = vand.u32 4294901760, %v5606_v23  ;;  %v5698_v23 = vand.u32 4294901760, %v4279_v38  ;;  %v5705_v38 = vand.u32 4294901760, %v4421_v53 }
 0x24a   :  { %v2796_v20 = vpack.c.bf16 %v5683_v43, %v5681_v62  ;;  %v2802_v50 = vpack.c.bf16 %v5689_v61, %v5688_v52  ;;  %v2810_v10 = vpack.c.bf16 %v5697_v58, %v5696_v57  ;;  %v2822_v43 = vpack.c.bf16 %v5709_v18, %v5708_v41  ;;  %v5735_v52 = vld [vmem:[#allocation46_spill] sm:$0xff] }
 0x24b   :  { %v2798_v63 = vpack.c.bf16 %v5685_v4, %v5684_v46  ;;  %v2804_v21 = vpack.c.bf16 %v5691_v59, %v5690_v48  ;;  %v2812_v17 = vpack.c.bf16 %v5699_v16, %v5698_v23  ;;  %v2818_v62 = vpack.c.bf16 %v5705_v38, %v5704_v6  ;;  %v5736_v61 = vld [vmem:[#allocation6_spill] sm:$0xff]  ;;  %v5738_v48 = vld [vmem:[#allocation61_spill] sm:$0xff] }
 0x24c   :  { %2791 = vmatpush1.bf16.msra.mxu1 %v2790_v31  ;;  %v2800_v31 = vpack.c.bf16 %v5687_v40, %v5686_v22  ;;  %v5710_v34 = vand.u32 4294901760, %v4563_v35  ;;  %v5712_v53 = vand.u32 4294901760, %v4579_v36  ;;  %v2828_v4 = vpack.c.bf16 %v5715_v19, %v5714_v7  ;;  %v5726_v36 = vld [vmem:[#allocation63_spill] sm:$0xff]  ;;  %v5733_v40 = vld [vmem:[#allocation18_spill] sm:$0xff]  ;;  %v5739_v59 = vld [vmem:[#allocation65_spill] sm:$0xff] }
 0x24d   :  { %2793 = vmatprep.subr.bf16.mxu1 %v2792_v9  ;;  %v2806_v9 = vpack.c.bf16 %v5693_v47, %v5692_v27  ;;  %v5717_v35 = vand.u32 4294901760, %v4640_v30  ;;  %v5719_v30 = vld [vmem:[#allocation7_spill] sm:$0xff]  ;;  %v5741_v27 = vld [vmem:[#allocation66_spill] sm:$0xff]  ;;  %v2287_v3 = vunpack.c.l.s4 %v2952_v44 }
 0x24e   :  { %v2826_v46 = vpack.c.bf16 %v5713_v14, %v5712_v53  ;;  %v5732_v22 = vld [vmem:[#allocation27_spill] sm:$0xff] }
 0x24f   :  { %v5742_v47 = vld [vmem:[#allocation67_spill] sm:$0xff]  ;;  %v2288_v16 = vunpack.c.0.s8 %v2287_v3 }
 0x250   :  { %2795 = vmatpush1.bf16.msra.mxu1 %v2794_v5  ;;  %v2816_v5 = vpack.c.bf16 %v5703_v33, %v5702_v2 }
 0x251   :  { %2797 = vmatprep.subr.bf16.mxu1 %v2796_v20  ;;  %v2824_v20 = vpack.c.bf16 %v5711_v32, %v5710_v34 }
 0x254   :  { %2799 = vmatpush1.bf16.msra.mxu1 %v2798_v63  ;;  %v2830_v63 = vpack.c.bf16 %v5717_v35, %v5716_v13 }
 0x255   :  { %2801 = vmatprep.subr.bf16.mxu1 %v2800_v31  ;;  %v5734_v31 = vld [vmem:[#allocation43_spill] sm:$0xff] }
 0x258   :  { %2803 = vmatpush1.bf16.msra.mxu1 %v2802_v50  ;;  %v5737_v50 = vld [vmem:[#allocation60_spill] sm:$0xff] }
 0x259   :  { %2805 = vmatprep.subr.bf16.mxu1 %v2804_v21  ;;  %v5740_v21 = vld [vmem:[#allocation19_spill] sm:$0xff] }
 0x25c   :  { %2807 = vmatpush1.bf16.msra.mxu1 %v2806_v9  ;;  %v987_v9 = vld [vmem:[%s5009_s4] sm:$0x3]  ;;  %s2312_s4 = sshll.u32 %s2953_s28, 4  ;;  %s2313_s4 = int_to_ptr.vmem [resolvable:$true] %s2312_s4 }
 0x25d   :  { %2809 = vmatprep.subr.bf16.mxu1 %v2808_v45  ;;  %v5743_v45 = vld [vmem:[#allocation68_spill] sm:$0xff]  ;;  %s2927_s29 = scalar_lea.vmem %s2313_s4, 32  ;;  %p2932_p1 = scmp.lt.s32.totalorder %s2313_s4, %s2313_s4 }
 0x25e   :  { %v5744_v57 = vsub.s32 0, %v5743_v45  ;;  %p2928_p0 = scmp.ne.s32.totalorder %s2313_s4, %s2927_s29  ;;  %p2933_p2 = scmp.lt.s32.totalorder %s2927_s29, %s2927_s29 }
 0x260   :  { %2811 = vmatpush1.bf16.msra.mxu1 %v2810_v10  ;;  %v992_v58 = vrot.slane %v987_v9, %v5744_v57  ;;  %v5745_v10 = vsub.s32 1, %v5743_v45  ;;  %p2934_p3 = por %p2933_p2, %p2932_p1 }
 0x261   :  { %2813 = vmatprep.subr.bf16.mxu1 %v2812_v17 }
 0x262   :  { %v996_v23 = vrot.slane %v987_v9, %v5745_v10  ;;  %p2935_p4 = pnand %p2934_p3, %p2928_p0 }
 0x264   :  { %2815 = vmatpush1.bf16.msra.mxu1 %v2814_v26 }
 0x265   :  { %2817 = vmatprep.subr.bf16.mxu1 %v2816_v5  ;;  %v2291_v5 = vsub.s32 %v2288_v16, %v5743_v45 }
 0x268   :  { %2819 = vmatpush1.bf16.msra.mxu1 %v2818_v62  ;;  %v5746_v62 = vlaneseq }
 0x269   :  { %2821 = vmatprep.subr.bf16.mxu1 %v2820_v0 }
 0x26a   :  { %vm2303_vm0 = vcmp.lt.s32.totalorder %v5746_v62, 192 }
 0x26c   :  { %2823 = vmatpush1.bf16.msra.mxu1 %v2822_v43 }
 0x26d   :  { %2825 = vmatprep.subr.bf16.mxu1 %v2824_v20 }
 0x270   :  { %2827 = vmatpush1.bf16.msra.mxu1 %v2826_v46 }
 0x271   :  { %2829 = vmatprep.subr.bf16.mxu1 %v2828_v4 }
 0x274   :  { %2831 = vmatpush1.bf16.msra.mxu1 %v2830_v63 }
 0x275   :  { %2833 = vmatprep.subr.bf16.mxu1 %v3592_v55  ;;  %v5720_v55 = vld [vmem:[#allocation50_spill] sm:$0xff] }
 0x277   :  { %2140 = vmatmul.mubr.f32.vlgmr.msra.gmra.mrb[0].mxu1 %v5718_v8 }
 0x278   :  { %2835 = vmatpush1.bf16.msra.mxu1 %v3621_v28  ;;  %2275 = vmatprep.mubr.f32.mxu1 %v5637_v24  ;;  %v5722_v28 = vld [vmem:[#allocation55_spill] sm:$0xff]  ;;  %v5731_v24 = vld [vmem:[#allocation26_spill] sm:$0xff] }
 0x279   :  { %2837 = vmatprep.subr.bf16.mxu1 %v3656_v39  ;;  %v5724_v39 = vld [vmem:[#allocation14_spill] sm:$0xff] }
 0x27c   :  { %2839 = vmatpush1.bf16.msra.mxu1 %v3716_v51  ;;  %v5725_v51 = vld [vmem:[#allocation58_spill] sm:$0xff] }
 0x27d   :  { %2841 = vmatprep.subr.bf16.mxu1 %v3741_v60 }
 0x280   :  { %2843 = vmatpush1.bf16.msra.mxu1 %v5514_v56 }
 0x281   :  { %2845 = vmatprep.subr.bf16.mxu1 %v5515_v54  ;;  %v5727_v54 = vld [vmem:[#allocation20_spill] sm:$0xff] }
 0x284   :  { %2847 = vmatpush1.bf16.msra.mxu1 %v5516_v12  ;;  %v5728_v12 = vld [vmem:[#allocation24_spill] sm:$0xff] }
 0x285   :  { %2849 = vmatprep.subr.bf16.mxu1 %v5719_v30 }
 0x288   :  { %2851 = vmatpush1.bf16.msra.mxu1 %v5720_v55 }
 0x289   :  { %2853 = vmatprep.subr.bf16.mxu1 %v5721_v11 }
 0x28c   :  { %2855 = vmatpush1.bf16.msra.mxu1 %v5722_v28 }
 0x28d   :  { %2857 = vmatprep.subr.bf16.mxu1 %v5723_v15 }
 0x290   :  { %2859 = vmatpush1.bf16.msra.mxu1 %v5724_v39 }
 0x291   :  { %2861 = vmatprep.subr.bf16.mxu1 %v5725_v51 }
 0x292   :  { %v1139_v60 = vpop.f32.mrb[2].mxu0 }
 0x293   :  { %v1141_v56 = vpop.f32.mrb[3].mxu0  ;;  %v1140_v17 = vadd.f32 %v1139_v60, %v992_v58 }
 0x294   :  { %2863 = vmatpush1.bf16.msra.mxu1 %v5726_v36  ;;  %v1142_v37 = vadd.f32 %v1141_v56, %v996_v23 }
 0x295   :  { %2865 = vmatprep.subr.bf16.mxu1 %v5727_v54 }
 0x298   :  { %2867 = vmatpush1.bf16.msra.mxu1 %v5728_v12 }
 0x299   :  { %2869 = vmatprep.subr.bf16.mxu1 %v5729_v42 }
 0x29c   :  { %2871 = vmatpush1.bf16.msra.mxu1 %v5730_v29 }
 0x29d   :  { %2873 = vmatprep.subr.bf16.mxu1 %v5731_v24 }
 0x2a0   :  { %2875 = vmatpush1.bf16.msra.mxu1 %v5732_v22 }
 0x2a1   :  { %2877 = vmatprep.subr.bf16.mxu1 %v5733_v40 }
 0x2a4   :  { %2879 = vmatpush1.bf16.msra.mxu1 %v5734_v31 }
 0x2a5   :  { %2881 = vmatprep.subr.bf16.mxu1 %v5735_v52 }
 0x2a8   :  { %2883 = vmatpush1.bf16.msra.mxu1 %v5736_v61 }
 0x2a9   :  { %2885 = vmatprep.subr.bf16.mxu1 %v5737_v50 }
 0x2ac   :  { %2887 = vmatpush1.bf16.msra.mxu1 %v5738_v48 }
 0x2ad   :  { %2889 = vmatprep.subr.bf16.mxu1 %v5739_v59 }
 0x2b0   :  { %2891 = vmatpush1.bf16.msra.mxu1 %v5740_v21 }
 0x2b1   :  { %2893 = vmatprep.subr.bf16.mxu1 %v5741_v27 }
 0x2b4   :  { %2895 = vmatpush1.bf16.msra.mxu1 %v5742_v47 }
 0x2b7   :  { %2277 = vmatmul.mubr.f32.vlgmr.msra.gmra.mrb[0].mxu1 %v5718_v8 }
 0x38a   :  { %v2278_v1 = vpop.f32.mrb[0].mxu1 }
 0x38b   :  { %v2899_v26 = vadd.f32 %v2278_v1, %v1140_v17  ;;  %v2280_v2 = vpop.f32.mrb[1].mxu1 }
 0x38c   :  { %v2901_v33 = vadd.f32 %v2280_v2, %v1142_v37 }
 0x38e   :  { %v2285_v6 = vcombine.low %v2899_v26, %v2901_v33 }
 0x390   :  { %v2292_v38 = vrot.slane %v2285_v6, %v2291_v5 }
 0x392   :  { %v2299_v25 = vrot.slane %v2292_v38, %v2291_v5 }
 0x394   :  { %2305 = vst.msk [vmem:[#allocation2] sm:$0x3] %vm2303_vm0, %v2299_v25 }
 0x395   :  { %2938 = shalt.err (!%p2935_p4)
}
 0x396   :  { %s2939_s7 = scalar_lea.hbm %s5010_s5, 32 }
 0x397   :  { %p2940_p5 = scmp.ne.s32.totalorder %s5010_s5, %s2939_s7  ;;  %p2943_p6 = scmp.lt.u32.totalorder %s2939_s7, %s5010_s5 }
 0x399   :  { %p2945_p7 = pnand %p2943_p6, %p2940_p5 }
 0x39b   :  { %2948 = shalt.err (!%p2945_p7)
}
 0x39c   :  { %2315 = dma.vmem_to_hbm [thread:$0]  %s2313_s4, 32, %s5010_s5, [#allocation3]  }
 0x39d   :  { %2949 = dma.done.wait [#allocation3], 32  }
 0x39e   :  { %2950 = vsyncadd [#allocation3], 4294967264 }
 0x39f   :  { %2319 = vsyncpa [#allocation3], 1 }

</bundles_post_ra>
